<compile_context>
chip_gen: v7x
topology: tpu7x:2x2x1
jax: 0.10.0
libtpu: 0.0.40
codegen_flags: <defaults>
</compile_context>

<pallas_src>
import math
from functools import partial

import jax
import jax.numpy as jnp
from jax import lax
from jax.experimental import pallas as pl
from jax.experimental.pallas import tpu as pltpu


# ------------------------------ tiling helpers ------------------------------

def _row_tile(m, target=512):
    """Sublane-dim tile that divides m (multiple of 8), or m itself."""
    if m <= target:
        return m
    t = (target // 8) * 8
    while t >= 8:
        if m % t == 0:
            return t
        t -= 8
    return m


def _lane_tile(n, target=512):
    """Lane-dim tile that divides n (multiple of 128), or n itself."""
    if n <= target:
        return n
    t = (target // 128) * 128
    while t >= 128:
        if n % t == 0:
            return t
        t -= 128
    return n


def _row_plan(m, target=512):
    """(tile, padded_rows): tile divides padded_rows; pads instead of one giant block."""
    if m <= target:
        return m, m
    t = (target // 8) * 8
    d = t
    while d >= 8:
        if m % d == 0:
            return d, m
        d -= 8
    return t, ((m + t - 1) // t) * t


def _pad_rows_to(x, rows):
    pad = rows - x.shape[0]
    if pad <= 0:
        return x
    return jnp.pad(x, ((0, pad),) + ((0, 0),) * (x.ndim - 1))


def _cost(flops=0, transcendentals=0, bytes_accessed=0):
    return pl.CostEstimate(flops=int(flops), transcendentals=int(transcendentals),
                           bytes_accessed=int(bytes_accessed))


def _parallel(n):
    return pltpu.CompilerParams(dimension_semantics=("parallel",) * n)


# ------------------------------ in-kernel helpers ----------------------------

def _layernorm(x, g, b, eps):
    mu = jnp.mean(x, axis=-1, keepdims=True)
    xc = x - mu
    var = jnp.mean(xc * xc, axis=-1, keepdims=True)
    return xc * lax.rsqrt(var + eps) * g + b


def _time_shift(xn):
    # xs[t] = xn[t-1], xs[0] = 0 (nn.ZeroPad2d((0,0,1,-1))).  Zero row + sublane
    # concatenate, all in VMEM -- no T x T matmul, no MXU flops.
    return jnp.concatenate([jnp.zeros_like(xn[:1]), xn[:-1]], axis=0)


# ------------------------------ Pallas kernels -------------------------------

def _embed_kernel(p_ref, w_ref, b_ref, pos_ref, g_ref, bb_ref, o_ref, *, eps):
    # patches @ W + conv bias + pos_emb, then encoder LayerNorm ln0, fused.
    acc = jnp.dot(p_ref[...], w_ref[...], preferred_element_type=jnp.float32)
    tok = acc + b_ref[...] + pos_ref[...]
    o_ref[...] = _layernorm(tok, g_ref[...], bb_ref[...], eps).astype(o_ref.dtype)


def _tm_pre_kernel(x_ref, g_ref, b_ref, mk_ref, mv_ref, mr_ref,
                   wk_ref, wv_ref, wr_ref, k_ref, v_ref, r_ref, *, eps):
    x = x_ref[...].astype(jnp.float32)                        # (T, C)
    xn = _layernorm(x, g_ref[...], b_ref[...], eps)
    xs = _time_shift(xn)
    mk, mv, mr = mk_ref[...], mv_ref[...], mr_ref[...]
    xk = (xn * mk + xs * (1.0 - mk)).astype(jnp.bfloat16)
    xv = (xn * mv + xs * (1.0 - mv)).astype(jnp.bfloat16)
    xr = (xn * mr + xs * (1.0 - mr)).astype(jnp.bfloat16)
    k_ref[...] = jnp.dot(xk, wk_ref[...],
                         preferred_element_type=jnp.float32).astype(k_ref.dtype)
    v_ref[...] = jnp.dot(xv, wv_ref[...],
                         preferred_element_type=jnp.float32).astype(v_ref.dtype)
    r_ref[...] = jnp.dot(xr, wr_ref[...],
                         preferred_element_type=jnp.float32).astype(r_ref.dtype)


def _wkv_kernel(w_ref, u_ref, k_ref, v_ref, y_ref, aa_ref, bb_ref, pp_ref):
    # Grid = (A//ct, T//tt) over (T, B, A)-laid-out k/v/y so each timestep slice
    # is a (B, ct) vreg-friendly tile.  The carry (aa, bb, pp) lives in VMEM
    # scratch across T-tiles; the T axis is the innermost ("arbitrary") axis.
    t_idx = pl.program_id(1)

    @pl.when(t_idx == 0)
    def _():
        aa_ref[...] = jnp.zeros_like(aa_ref)
        bb_ref[...] = jnp.zeros_like(bb_ref)
        pp_ref[...] = jnp.full(pp_ref.shape, -1e38, dtype=pp_ref.dtype)

    w = w_ref[...]                                   # (1, ct) = -exp(time_decay)
    u = u_ref[...]                                   # (1, ct)
    Tt = k_ref.shape[0]

    def body(t, carry):
        aa, bb, pp = carry
        kt = k_ref[t].astype(jnp.float32)            # (B, ct)
        vt = v_ref[t].astype(jnp.float32)
        ww = u + kt
        p = jnp.maximum(pp, ww)
        e1 = jnp.exp(pp - p)
        e2 = jnp.exp(ww - p)
        y_ref[t] = ((e1 * aa + e2 * vt) / (e1 * bb + e2)).astype(y_ref.dtype)
        ww2 = w + pp
        p2 = jnp.maximum(ww2, kt)
        e1b = jnp.exp(ww2 - p2)
        e2b = jnp.exp(kt - p2)
        return (e1b * aa + e2b * vt, e1b * bb + e2b, p2)

    if Tt % 8 == 0:
        unroll = 8
    elif Tt % 4 == 0:
        unroll = 4
    elif Tt % 2 == 0:
        unroll = 2
    else:
        unroll = 1
    aa, bb, pp = lax.fori_loop(0, Tt, body,
                               (aa_ref[...], bb_ref[...], pp_ref[...]),
                               unroll=unroll)
    aa_ref[...] = aa
    bb_ref[...] = bb
    pp_ref[...] = pp


def _tm_post_cm_pre_kernel(r_ref, y_ref, wo_ref, x_ref, g_ref, b_ref,
                           mk_ref, mr_ref, wk_ref, wr_ref,
                           x1_ref, kk_ref, r2_ref, *, eps):
    # sigmoid(r)*wkv -> out-projection -> +residual, then LN2 + time-shift +
    # mix + key/receptance + squared-ReLU, all in one pass (no HBM round-trip
    # of the residual stream between TimeMix and ChannelMix).
    sr = jax.nn.sigmoid(r_ref[...].astype(jnp.float32))
    gated = (sr * y_ref[...].astype(jnp.float32)).astype(jnp.bfloat16)
    x1 = x_ref[...].astype(jnp.float32) + jnp.dot(
        gated, wo_ref[...], preferred_element_type=jnp.float32)
    x1_ref[...] = x1.astype(x1_ref.dtype)
    xn = _layernorm(x1, g_ref[...], b_ref[...], eps)
    xs = _time_shift(xn)
    mk, mr = mk_ref[...], mr_ref[...]
    xk = (xn * mk + xs * (1.0 - mk)).astype(jnp.bfloat16)
    xr = (xn * mr + xs * (1.0 - mr)).astype(jnp.bfloat16)
    k = jnp.dot(xk, wk_ref[...], preferred_element_type=jnp.float32)
    k = jnp.maximum(k, 0.0)
    kk_ref[...] = (k * k).astype(kk_ref.dtype)                # relu(k)^2
    r2_ref[...] = jnp.dot(xr, wr_ref[...],
                          preferred_element_type=jnp.float32).astype(r2_ref.dtype)


def _cm_post_mlp_kernel(kk_ref, wv_ref, r2_ref, x_ref, g_ref, b_ref,
                        w1_ref, b1_ref, w2_ref, b2_ref, o_ref, *, eps):
    # k^2 @ W_value, sigmoid gate, +residual, then LN3 + W1 + GELU + W2 + bias
    # + residual: the entire ChannelMix-tail + MLP in one row-tiled kernel.
    kv = jnp.dot(kk_ref[...], wv_ref[...], preferred_element_type=jnp.float32)
    sr = jax.nn.sigmoid(r2_ref[...].astype(jnp.float32))
    x2 = x_ref[...].astype(jnp.float32) + sr * kv
    xn = _layernorm(x2, g_ref[...], b_ref[...], eps).astype(jnp.bfloat16)
    h = jnp.dot(xn, w1_ref[...], preferred_element_type=jnp.float32) + b1_ref[...]
    # exact (erf) GELU, matching torch.nn.GELU(approximate='none')
    h = 0.5 * h * (1.0 + lax.erf(h * (1.0 / math.sqrt(2.0))))
    proj = jnp.dot(h.astype(jnp.bfloat16), w2_ref[...],
                   preferred_element_type=jnp.float32)
    o_ref[...] = (x2 + proj + b2_ref[...]).astype(o_ref.dtype)


def _ln_kernel(x_ref, g_ref, b_ref, o_ref, *, eps):
    o_ref[...] = _layernorm(x_ref[...].astype(jnp.float32), g_ref[...],
                            b_ref[...], eps).astype(o_ref.dtype)


def _matmul_bias_kernel(x_ref, w_ref, b_ref, o_ref, acc_ref):
    @pl.when(pl.program_id(2) == 0)
    def _():
        acc_ref[...] = jnp.zeros_like(acc_ref)

    acc_ref[...] += jnp.dot(x_ref[...], w_ref[...],
                            preferred_element_type=jnp.float32)

    @pl.when(pl.program_id(2) == pl.num_programs(2) - 1)
    def _():
        o_ref[...] = (acc_ref[...] + b_ref[...]).astype(o_ref.dtype)


# ------------------------------ kernel wrappers ------------------------------

def patch_embed(patches, w, b, pos, ln_g, ln_b, eps):
    N, S, K = patches.shape
    C = w.shape[1]
    patches = patches.astype(jnp.bfloat16)          # halve the HBM->VMEM DMA
    return pl.pallas_call(
        partial(_embed_kernel, eps=eps),
        out_shape=jax.ShapeDtypeStruct((N, S, C), jnp.float32),
        grid=(N,),
        in_specs=[
            pl.BlockSpec((None, S, K), lambda n: (n, 0, 0)),
            pl.BlockSpec((K, C), lambda n: (0, 0)),
            pl.BlockSpec((1, C), lambda n: (0, 0)),
            pl.BlockSpec((S, C), lambda n: (0, 0)),
            pl.BlockSpec((1, C), lambda n: (0, 0)),
            pl.BlockSpec((1, C), lambda n: (0, 0)),
        ],
        out_specs=pl.BlockSpec((None, S, C), lambda n: (n, 0, 0)),
        compiler_params=_parallel(1),
        cost_estimate=_cost(flops=2 * N * S * K * C,
                            bytes_accessed=2 * N * S * K + 4 * N * S * C),
    )(patches, w, b.reshape(1, C), pos, ln_g.reshape(1, C), ln_b.reshape(1, C))


def timemix_pre(x, ln_g, ln_b, mix_k, mix_v, mix_r, wk, wv, wr, eps=1e-6):
    B, T, C = x.shape
    A = wk.shape[1]
    row = pl.BlockSpec((1, C), lambda b: (0, 0))
    out_sp = pl.BlockSpec((None, T, A), lambda b: (b, 0, 0))
    return pl.pallas_call(
        partial(_tm_pre_kernel, eps=eps),
        out_shape=(jax.ShapeDtypeStruct((B, T, A), jnp.bfloat16),
                   jax.ShapeDtypeStruct((B, T, A), jnp.bfloat16),
                   jax.ShapeDtypeStruct((B, T, A), jnp.bfloat16)),
        grid=(B,),
        in_specs=[
            pl.BlockSpec((None, T, C), lambda b: (b, 0, 0)),
            row, row, row, row, row,
            pl.BlockSpec((C, A), lambda b: (0, 0)),
            pl.BlockSpec((C, A), lambda b: (0, 0)),
            pl.BlockSpec((C, A), lambda b: (0, 0)),
        ],
        out_specs=(out_sp, out_sp, out_sp),
        compiler_params=_parallel(1),
        cost_estimate=_cost(flops=2 * B * T * C * 3 * A,
                            bytes_accessed=4 * B * T * C + 2 * B * T * 3 * A),
    )(x, ln_g.reshape(1, C), ln_b.reshape(1, C),
      mix_k.reshape(1, C), mix_v.reshape(1, C), mix_r.reshape(1, C),
      wk, wv, wr)


def wkv(w_neg, u, k_tba, v_tba):
    """w_neg, u: (A,) f32 ; k, v: (T, B, A) bf16.  Returns (T, B, A) bf16."""
    T, B, A = k_tba.shape
    ct = _lane_tile(A, 512)
    tt = _row_tile(T, 256)
    kv_spec = pl.BlockSpec((tt, B, ct), lambda c, t: (t, 0, c))
    return pl.pallas_call(
        _wkv_kernel,
        out_shape=jax.ShapeDtypeStruct((T, B, A), jnp.bfloat16),
        grid=(A // ct, T // tt),
        in_specs=[
            pl.BlockSpec((1, ct), lambda c, t: (0, c)),
            pl.BlockSpec((1, ct), lambda c, t: (0, c)),
            kv_spec,
            kv_spec,
        ],
        out_specs=kv_spec,
        scratch_shapes=[pltpu.VMEM((B, ct), jnp.float32),
                        pltpu.VMEM((B, ct), jnp.float32),
                        pltpu.VMEM((B, ct), jnp.float32)],
        compiler_params=pltpu.CompilerParams(
            dimension_semantics=("parallel", "arbitrary")),
        cost_estimate=_cost(flops=12 * B * T * A, transcendentals=4 * B * T * A,
                            bytes_accessed=2 * 3 * B * T * A),
    )(w_neg.reshape(1, A), u.reshape(1, A), k_tba, v_tba)


def timemix_post_channelmix_pre(r, y, out_w, x, ln_g, ln_b, mix_k, mix_r,
                                key_w, recep_w, eps=1e-6):
    B, T, A = r.shape
    C = out_w.shape[1]
    F = key_w.shape[1]
    vec = pl.BlockSpec((1, C), lambda b: (0, 0))
    bta = pl.BlockSpec((None, T, A), lambda b: (b, 0, 0))
    btc = pl.BlockSpec((None, T, C), lambda b: (b, 0, 0))
    btf = pl.BlockSpec((None, T, F), lambda b: (b, 0, 0))
    return pl.pallas_call(
        partial(_tm_post_cm_pre_kernel, eps=eps),
        out_shape=(jax.ShapeDtypeStruct((B, T, C), jnp.float32),
                   jax.ShapeDtypeStruct((B, T, F), jnp.bfloat16),
                   jax.ShapeDtypeStruct((B, T, C), jnp.bfloat16)),
        grid=(B,),
        in_specs=[
            bta, bta,
            pl.BlockSpec((A, C), lambda b: (0, 0)),
            btc,
            vec, vec, vec, vec,
            pl.BlockSpec((C, F), lambda b: (0, 0)),
            pl.BlockSpec((C, C), lambda b: (0, 0)),
        ],
        out_specs=(btc, btf, btc),
        compiler_params=_parallel(1),
        cost_estimate=_cost(flops=2 * B * T * (A * C + C * F + C * C),
                            transcendentals=B * T * A,
                            bytes_accessed=2 * B * T * (2 * A + F + C)
                            + 4 * B * T * 2 * C),
    )(r, y, out_w, x, ln_g.reshape(1, C), ln_b.reshape(1, C),
      mix_k.reshape(1, C), mix_r.reshape(1, C), key_w, recep_w)


def channelmix_post_mlp(kk, value_w, r2, x1, ln_g, ln_b, w1, b1, w2, b2,
                        eps=1e-6):
    M, F = kk.shape
    C = value_w.shape[1]
    tm, Mp = _row_plan(M, 512)
    kk_p = _pad_rows_to(kk, Mp)
    r2_p = _pad_rows_to(r2, Mp)
    x1_p = _pad_rows_to(x1, Mp)
    vec_c = pl.BlockSpec((1, C), lambda i: (0, 0))
    out = pl.pallas_call(
        partial(_cm_post_mlp_kernel, eps=eps),
        out_shape=jax.ShapeDtypeStruct((Mp, C), jnp.float32),
        grid=(Mp // tm,),
        in_specs=[
            pl.BlockSpec((tm, F), lambda i: (i, 0)),
            pl.BlockSpec((F, C), lambda i: (0, 0)),
            pl.BlockSpec((tm, C), lambda i: (i, 0)),
            pl.BlockSpec((tm, C), lambda i: (i, 0)),
            vec_c, vec_c,
            pl.BlockSpec((C, F), lambda i: (0, 0)),
            pl.BlockSpec((1, F), lambda i: (0, 0)),
            pl.BlockSpec((F, C), lambda i: (0, 0)),
            vec_c,
        ],
        out_specs=pl.BlockSpec((tm, C), lambda i: (i, 0)),
        compiler_params=_parallel(1),
        cost_estimate=_cost(flops=2 * Mp * (3 * F * C),
                            transcendentals=Mp * (C + F),
                            bytes_accessed=2 * Mp * (F + 2 * C) + 8 * Mp * C),
    )(kk_p, value_w, r2_p, x1_p, ln_g.reshape(1, C), ln_b.reshape(1, C),
      w1, b1.reshape(1, F), w2, b2.reshape(1, C))
    return out if Mp == M else out[:M]


def layernorm(x, g, b, eps):
    M, C = x.shape
    tm, Mp = _row_plan(M, 1024)
    xp = _pad_rows_to(x, Mp)
    out = pl.pallas_call(
        partial(_ln_kernel, eps=eps),
        out_shape=jax.ShapeDtypeStruct((Mp, C), jnp.float32),
        grid=(Mp // tm,),
        in_specs=[
            pl.BlockSpec((tm, C), lambda i: (i, 0)),
            pl.BlockSpec((1, C), lambda i: (0, 0)),
            pl.BlockSpec((1, C), lambda i: (0, 0)),
        ],
        out_specs=pl.BlockSpec((tm, C), lambda i: (i, 0)),
        compiler_params=_parallel(1),
    )(xp, g.reshape(1, C), b.reshape(1, C))
    return out if Mp == M else out[:M]


def linear_bias(x, w, b):
    """Grid-tiled matmul (M, N, K) with f32 VMEM accumulator (classification head)."""
    M, K = x.shape
    N = w.shape[1]
    tm, Mp = _row_plan(M, 256)
    tn = _lane_tile(N, 256)
    tk = _lane_tile(K, 512)
    xp = _pad_rows_to(x.astype(jnp.bfloat16), Mp)   # bf16 MXU operand in wrapper
    out = pl.pallas_call(
        _matmul_bias_kernel,
        out_shape=jax.ShapeDtypeStruct((Mp, N), jnp.float32),
        grid=(Mp // tm, N // tn, K // tk),
        in_specs=[
            pl.BlockSpec((tm, tk), lambda i, j, k: (i, k)),
            pl.BlockSpec((tk, tn), lambda i, j, k: (k, j)),
            pl.BlockSpec((1, tn), lambda i, j, k: (0, j)),
        ],
        out_specs=pl.BlockSpec((tm, tn), lambda i, j, k: (i, j)),
        scratch_shapes=[pltpu.VMEM((tm, tn), jnp.float32)],
        compiler_params=pltpu.CompilerParams(
            dimension_semantics=("parallel", "parallel", "arbitrary")),
        cost_estimate=_cost(flops=2 * Mp * N * K,
                            bytes_accessed=2 * (Mp * K + K * N) + 4 * Mp * N),
    )(xp, w, b.reshape(1, N))
    return out if Mp == M else out[:M]


# ------------------------------ model forward --------------------------------

def block_forward(p, x):
    B, T, C = x.shape
    att = p['att']
    # --- time-mix (attention) branch: LN1 + shift + mix + K/V/R, fused
    k, v, r = timemix_pre(x, p['ln1_g'], p['ln1_b'],
                          att['time_mix_k'], att['time_mix_v'], att['time_mix_r'],
                          att['key_w'], att['value_w'], att['recep_w'])
    w_neg = -jnp.exp(att['time_decay'].astype(jnp.float32))
    u = att['time_first'].astype(jnp.bfloat16).astype(jnp.float32)  # bf16 round
    # WKV consumes (T, B, A) so the batch fills the sublane dim of every step.
    y = wkv(w_neg, u, k.transpose(1, 0, 2), v.transpose(1, 0, 2))
    y = y.transpose(1, 0, 2)                                    # back to (B,T,A)
    # --- fused: gate + out-proj + residual + LN2 + shift + mix + key/recep
    ffn = p['ffn']
    x1, kk, r2 = timemix_post_channelmix_pre(
        r, y, att['out_w'], x, p['ln2_g'], p['ln2_b'],
        ffn['time_mix_k'], ffn['time_mix_r'], ffn['key_w'], ffn['recep_w'])
    # --- fused: k^2 @ W_value + gate + residual + LN3 + MLP + residual
    F = kk.shape[-1]
    mlp = p['mlp']
    x_out = channelmix_post_mlp(
        kk.reshape(B * T, F), ffn['value_w'], r2.reshape(B * T, C),
        x1.reshape(B * T, C), p['ln3_g'], p['ln3_b'],
        mlp['w1'], mlp['b1'], mlp['w2'], mlp['b2'])
    # TODO(synk): dropout layers are identity here (inference / dropout=0.0)
    return x_out.reshape(B, T, C)


def vision_rwkv_forward(params, x, cfg, include_head=False):
    N, Cin, H, W = x.shape
    pch = cfg['patch_size']
    nh, nw = H // pch, W // pch
    seq = nh * nw
    # conv_proj (kernel == stride == patch) == patchify + matmul.  The patchify
    # reshape/transpose is pure layout glue left to XLA; bias + pos_emb + ln0
    # are fused into the patch-embed kernel.  The reference class-token concat
    # is dead work (Encoder drops it immediately via input[:, 1:]) -> omitted.
    patches = x.reshape(N, Cin, nh, pch, nw, pch).transpose(0, 2, 4, 1, 3, 5)
    patches = patches.reshape(N, seq, Cin * pch * pch)
    h = patch_embed(patches, params['conv_w'], params['conv_b'],
                    params['pos_emb'], params['ln0_g'], params['ln0_b'],
                    eps=1e-5)                                  # ln0 default eps
    for blk in params['blocks']:
        h = block_forward(blk, h)
    B, T, C = h.shape
    out = layernorm(h.reshape(B * T, C), params['ln_g'], params['ln_b'],
                    eps=1e-6).reshape(B, T, C)
    if include_head:
        out = linear_bias(out[:, 0, :], params['head_w'], params['head_b'])
    return out


# ------------------------------ parameter init -------------------------------

def init_params(key, cfg):
    C, A, F = cfg['n_embd'], cfg['dim_att'], cfg['dim_ffn']
    pch = cfg['patch_size']
    seq = (cfg['image_size'] // pch) ** 2
    kin = 3 * pch * pch
    keys = iter(jax.random.split(key, 1024))

    def nxt():
        return next(keys)

    def xavier_bf16(fan_in, fan_out):
        lim = math.sqrt(6.0 / (fan_in + fan_out))
        w = jax.random.uniform(nxt(), (fan_in, fan_out), jnp.float32, -lim, lim)
        return w.astype(jnp.bfloat16)        # bf16 weight storage for the MXU

    def nrm(shape, std):
        return std * jax.random.normal(nxt(), shape, jnp.float32)

    params = {
        # conv_proj stored pre-flattened as (Cin*p*p, hidden), bf16
        'conv_w': nrm((kin, C), math.sqrt(1.0 / kin)).astype(jnp.bfloat16),
        'conv_b': jnp.zeros((C,), jnp.float32),
        'pos_emb': nrm((seq, C), 0.02),
        'ln0_g': jnp.ones((C,), jnp.float32),
        'ln0_b': jnp.zeros((C,), jnp.float32),
        'ln_g': jnp.ones((C,), jnp.float32),
        'ln_b': jnp.zeros((C,), jnp.float32),
        'head_w': jnp.zeros((C, cfg['num_classes']), jnp.bfloat16),
        'head_b': jnp.zeros((cfg['num_classes'],), jnp.float32),
        'blocks': [],
    }
    for _ in range(cfg['n_layer']):
        blk = {
            'ln1_g': jnp.ones((C,), jnp.float32),
            'ln1_b': jnp.zeros((C,), jnp.float32),
            'ln2_g': jnp.ones((C,), jnp.float32),
            'ln2_b': jnp.zeros((C,), jnp.float32),
            'ln3_g': jnp.ones((C,), jnp.float32),
            'ln3_b': jnp.zeros((C,), jnp.float32),
            'att': {
                'time_decay': nrm((A,), 0.02),
                'time_first': nrm((A,), 0.02),
                'time_mix_k': nrm((C,), 0.02),
                'time_mix_v': nrm((C,), 0.02),
                'time_mix_r': nrm((C,), 0.02),
                'key_w': xavier_bf16(C, A),
                'value_w': xavier_bf16(C, A),
                'recep_w': xavier_bf16(C, A),
                'out_w': xavier_bf16(A, C),
            },
            'ffn': {
                'time_mix_k': nrm((C,), 0.02),
                'time_mix_r': nrm((C,), 0.02),
                'key_w': xavier_bf16(C, F),
                'recep_w': xavier_bf16(C, C),
                'value_w': xavier_bf16(F, C),
            },
            'mlp': {
                'w1': xavier_bf16(C, F), 'b1': nrm((F,), 1e-6),
                'w2': xavier_bf16(F, C), 'b2': nrm((C,), 1e-6),
            },
        }
        params['blocks'].append(blk)
    return params


# ------------------------------ main ------------------------------

if __name__ == "__main__":
    cfg = {
        'image_size': 16,
        'patch_size': 8,
        'n_embd': 32,        # == hidden_dim
        'dim_att': 32,
        'dim_ffn': 64,
        'n_layer': 2,
        'dropout': 0.0,
        'num_classes': 10,
    }
    key = jax.random.PRNGKey(0)
    kp, kx = jax.random.split(key)
    params = init_params(kp, cfg)

    x = jax.random.normal(kx, (2, 3, cfg['image_size'], cfg['image_size']),
                          jnp.float32)

    fwd = jax.jit(partial(vision_rwkv_forward, cfg=cfg, include_head=False))
    out = jax.block_until_ready(fwd(params, x))
    seq = (cfg['image_size'] // cfg['patch_size']) ** 2
    assert out.shape == (2, seq, cfg['n_embd'])
    assert bool(jnp.all(jnp.isfinite(out)))

    # also exercise the grid-tiled classification-head matmul
    head_fwd = jax.jit(partial(vision_rwkv_forward, cfg=cfg, include_head=True))
    logits = jax.block_until_ready(head_fwd(params, x))
    assert logits.shape == (2, cfg['num_classes'])
    assert bool(jnp.all(jnp.isfinite(logits)))

    print("KERNEL_OK")
</pallas_src>

<mosaic_0001>
module attributes {stable_mosaic.version = 11 : i64} {
  func.func @_tm_pre_kernel(%arg0: i32, %arg1: memref<1x4x32xf32, #tpu.memory_space<vmem>>, %arg2: memref<1x32xf32, #tpu.memory_space<vmem>>, %arg3: memref<1x32xf32, #tpu.memory_space<vmem>>, %arg4: memref<1x32xf32, #tpu.memory_space<vmem>>, %arg5: memref<1x32xf32, #tpu.memory_space<vmem>>, %arg6: memref<1x32xf32, #tpu.memory_space<vmem>>, %arg7: memref<32x32xbf16, #tpu.memory_space<vmem>>, %arg8: memref<32x32xbf16, #tpu.memory_space<vmem>>, %arg9: memref<32x32xbf16, #tpu.memory_space<vmem>>, %arg10: memref<1x4x32xbf16, #tpu.memory_space<vmem>>, %arg11: memref<1x4x32xbf16, #tpu.memory_space<vmem>>, %arg12: memref<1x4x32xbf16, #tpu.memory_space<vmem>>) attributes {dimension_semantics = [#tpu.dimension_semantics<parallel>], iteration_bounds = array<i64: 2>, scalar_prefetch = 0 : i64, scratch_operands = 0 : i64, tpu.core_type = #tpu.core_type<tc>, window_params = [{transform_indices = @transform_0, window_bounds = array<i64: 1, 4, 32>}, {pipeline_mode = #tpu.pipeline_mode<synchronous>, transform_indices = @transform_1, window_bounds = array<i64: 1, 32>}, {pipeline_mode = #tpu.pipeline_mode<synchronous>, transform_indices = @transform_2, window_bounds = array<i64: 1, 32>}, {pipeline_mode = #tpu.pipeline_mode<synchronous>, transform_indices = @transform_3, window_bounds = array<i64: 1, 32>}, {pipeline_mode = #tpu.pipeline_mode<synchronous>, transform_indices = @transform_4, window_bounds = array<i64: 1, 32>}, {pipeline_mode = #tpu.pipeline_mode<synchronous>, transform_indices = @transform_5, window_bounds = array<i64: 1, 32>}, {pipeline_mode = #tpu.pipeline_mode<synchronous>, transform_indices = @transform_6, window_bounds = array<i64: 32, 32>}, {pipeline_mode = #tpu.pipeline_mode<synchronous>, transform_indices = @transform_7, window_bounds = array<i64: 32, 32>}, {pipeline_mode = #tpu.pipeline_mode<synchronous>, transform_indices = @transform_8, window_bounds = array<i64: 32, 32>}, {transform_indices = @transform_9, window_bounds = array<i64: 1, 4, 32>}, {transform_indices = @transform_10, window_bounds = array<i64: 1, 4, 32>}, {transform_indices = @transform_11, window_bounds = array<i64: 1, 4, 32>}]} {
    %c0 = arith.constant 0 : index
    %c0_0 = arith.constant 0 : index
    %c0_1 = arith.constant 0 : index
    %0 = vector.load %arg1[%c0, %c0_0, %c0_1] : memref<1x4x32xf32, #tpu.memory_space<vmem>>, vector<1x4x32xf32>
    %1 = vector.shape_cast %0 : vector<1x4x32xf32> to vector<4x32xf32>
    %c0_2 = arith.constant 0 : index
    %c0_3 = arith.constant 0 : index
    %2 = vector.load %arg2[%c0_2, %c0_3] : memref<1x32xf32, #tpu.memory_space<vmem>>, vector<1x32xf32>
    %c0_4 = arith.constant 0 : index
    %c0_5 = arith.constant 0 : index
    %3 = vector.load %arg3[%c0_4, %c0_5] : memref<1x32xf32, #tpu.memory_space<vmem>>, vector<1x32xf32>
    %cst = arith.constant dense<0.000000e+00> : vector<4xf32>
    %4 = vector.multi_reduction <add>, %1, %cst [1] : vector<4x32xf32> to vector<4xf32>
    %5 = vector.shape_cast %4 : vector<4xf32> to vector<4x1xf32>
    %cst_6 = arith.constant 3.200000e+01 : f32
    %6 = vector.broadcast %cst_6 : f32 to vector<4x1xf32>
    %7 = arith.divf %5, %6 : vector<4x1xf32>
    %8 = vector.broadcast %7 : vector<4x1xf32> to vector<4x32xf32>
    %9 = arith.subf %1, %8 : vector<4x32xf32>
    %10 = arith.mulf %9, %9 : vector<4x32xf32>
    %cst_7 = arith.constant dense<0.000000e+00> : vector<4xf32>
    %11 = vector.multi_reduction <add>, %10, %cst_7 [1] : vector<4x32xf32> to vector<4xf32>
    %12 = vector.shape_cast %11 : vector<4xf32> to vector<4x1xf32>
    %cst_8 = arith.constant 3.200000e+01 : f32
    %13 = vector.broadcast %cst_8 : f32 to vector<4x1xf32>
    %14 = arith.divf %12, %13 : vector<4x1xf32>
    %cst_9 = arith.constant 9.99999997E-7 : f32
    %15 = vector.broadcast %cst_9 : f32 to vector<4x1xf32>
    %16 = arith.addf %14, %15 : vector<4x1xf32>
    %17 = math.rsqrt %16 : vector<4x1xf32>
    %18 = vector.broadcast %17 : vector<4x1xf32> to vector<4x32xf32>
    %19 = arith.mulf %9, %18 : vector<4x32xf32>
    %20 = vector.broadcast %2 : vector<1x32xf32> to vector<4x32xf32>
    %21 = arith.mulf %19, %20 : vector<4x32xf32>
    %22 = vector.broadcast %3 : vector<1x32xf32> to vector<4x32xf32>
    %23 = arith.addf %21, %22 : vector<4x32xf32>
    %cst_10 = arith.constant 0.000000e+00 : f32
    %24 = vector.broadcast %cst_10 : f32 to vector<1x32xf32>
    %25 = vector.extract_strided_slice %23 {offsets = [0, 0], sizes = [3, 32], strides = [1, 1]} : vector<4x32xf32> to vector<3x32xf32>
    %26 = tpu.concatenate %24, %25 in 0 : vector<1x32xf32>, vector<3x32xf32> -> vector<4x32xf32>
    %c0_11 = arith.constant 0 : index
    %c0_12 = arith.constant 0 : index
    %27 = vector.load %arg4[%c0_11, %c0_12] : memref<1x32xf32, #tpu.memory_space<vmem>>, vector<1x32xf32>
    %c0_13 = arith.constant 0 : index
    %c0_14 = arith.constant 0 : index
    %28 = vector.load %arg5[%c0_13, %c0_14] : memref<1x32xf32, #tpu.memory_space<vmem>>, vector<1x32xf32>
    %c0_15 = arith.constant 0 : index
    %c0_16 = arith.constant 0 : index
    %29 = vector.load %arg6[%c0_15, %c0_16] : memref<1x32xf32, #tpu.memory_space<vmem>>, vector<1x32xf32>
    %30 = vector.broadcast %27 : vector<1x32xf32> to vector<4x32xf32>
    %31 = arith.mulf %23, %30 : vector<4x32xf32>
    %cst_17 = arith.constant 1.000000e+00 : f32
    %32 = vector.broadcast %cst_17 : f32 to vector<1x32xf32>
    %33 = arith.subf %32, %27 : vector<1x32xf32>
    %34 = vector.broadcast %33 : vector<1x32xf32> to vector<4x32xf32>
    %35 = arith.mulf %26, %34 : vector<4x32xf32>
    %36 = arith.addf %31, %35 : vector<4x32xf32>
    %37 = arith.truncf %36 : vector<4x32xf32> to vector<4x32xbf16>
    %38 = vector.broadcast %28 : vector<1x32xf32> to vector<4x32xf32>
    %39 = arith.mulf %23, %38 : vector<4x32xf32>
    %cst_18 = arith.constant 1.000000e+00 : f32
    %40 = vector.broadcast %cst_18 : f32 to vector<1x32xf32>
    %41 = arith.subf %40, %28 : vector<1x32xf32>
    %42 = vector.broadcast %41 : vector<1x32xf32> to vector<4x32xf32>
    %43 = arith.mulf %26, %42 : vector<4x32xf32>
    %44 = arith.addf %39, %43 : vector<4x32xf32>
    %45 = arith.truncf %44 : vector<4x32xf32> to vector<4x32xbf16>
    %46 = vector.broadcast %29 : vector<1x32xf32> to vector<4x32xf32>
    %47 = arith.mulf %23, %46 : vector<4x32xf32>
    %cst_19 = arith.constant 1.000000e+00 : f32
    %48 = vector.broadcast %cst_19 : f32 to vector<1x32xf32>
    %49 = arith.subf %48, %29 : vector<1x32xf32>
    %50 = vector.broadcast %49 : vector<1x32xf32> to vector<4x32xf32>
    %51 = arith.mulf %26, %50 : vector<4x32xf32>
    %52 = arith.addf %47, %51 : vector<4x32xf32>
    %53 = arith.truncf %52 : vector<4x32xf32> to vector<4x32xbf16>
    %c0_20 = arith.constant 0 : index
    %c0_21 = arith.constant 0 : index
    %54 = vector.load %arg7[%c0_20, %c0_21] : memref<32x32xbf16, #tpu.memory_space<vmem>>, vector<32x32xbf16>
    %cst_22 = arith.constant dense<0.000000e+00> : vector<4x32xf32>
    %55 = tpu.matmul %37, %54, %cst_22 {dimension_numbers = #tpu.dot_dimension_numbers<[1], [0], [0], [1], [0, 0, 1, 1], [], []>} : vector<4x32xbf16>, vector<32x32xbf16>, vector<4x32xf32> -> vector<4x32xf32>
    %56 = arith.truncf %55 : vector<4x32xf32> to vector<4x32xbf16>
    %c0_23 = arith.constant 0 : index
    %c0_24 = arith.constant 0 : index
    %c0_25 = arith.constant 0 : index
    %57 = vector.load %arg10[%c0_23, %c0_24, %c0_25] : memref<1x4x32xbf16, #tpu.memory_space<vmem>>, vector<1x4x32xbf16>
    %58 = vector.shape_cast %57 : vector<1x4x32xbf16> to vector<4x32xbf16>
    %59 = vector.shape_cast %56 : vector<4x32xbf16> to vector<1x4x32xbf16>
    tpu.vector_store %arg10[%c0_23, %c0_24, %c0_25], %59 {strides = array<i32>} : memref<1x4x32xbf16, #tpu.memory_space<vmem>>, vector<1x4x32xbf16>,
    %c0_26 = arith.constant 0 : index
    %c0_27 = arith.constant 0 : index
    %60 = vector.load %arg8[%c0_26, %c0_27] : memref<32x32xbf16, #tpu.memory_space<vmem>>, vector<32x32xbf16>
    %cst_28 = arith.constant dense<0.000000e+00> : vector<4x32xf32>
    %61 = tpu.matmul %45, %60, %cst_28 {dimension_numbers = #tpu.dot_dimension_numbers<[1], [0], [0], [1], [0, 0, 1, 1], [], []>} : vector<4x32xbf16>, vector<32x32xbf16>, vector<4x32xf32> -> vector<4x32xf32>
    %62 = arith.truncf %61 : vector<4x32xf32> to vector<4x32xbf16>
    %c0_29 = arith.constant 0 : index
    %c0_30 = arith.constant 0 : index
    %c0_31 = arith.constant 0 : index
    %63 = vector.load %arg11[%c0_29, %c0_30, %c0_31] : memref<1x4x32xbf16, #tpu.memory_space<vmem>>, vector<1x4x32xbf16>
    %64 = vector.shape_cast %63 : vector<1x4x32xbf16> to vector<4x32xbf16>
    %65 = vector.shape_cast %62 : vector<4x32xbf16> to vector<1x4x32xbf16>
    tpu.vector_store %arg11[%c0_29, %c0_30, %c0_31], %65 {strides = array<i32>} : memref<1x4x32xbf16, #tpu.memory_space<vmem>>, vector<1x4x32xbf16>,
    %c0_32 = arith.constant 0 : index
    %c0_33 = arith.constant 0 : index
    %66 = vector.load %arg9[%c0_32, %c0_33] : memref<32x32xbf16, #tpu.memory_space<vmem>>, vector<32x32xbf16>
    %cst_34 = arith.constant dense<0.000000e+00> : vector<4x32xf32>
    %67 = tpu.matmul %53, %66, %cst_34 {dimension_numbers = #tpu.dot_dimension_numbers<[1], [0], [0], [1], [0, 0, 1, 1], [], []>} : vector<4x32xbf16>, vector<32x32xbf16>, vector<4x32xf32> -> vector<4x32xf32>
    %68 = arith.truncf %67 : vector<4x32xf32> to vector<4x32xbf16>
    %c0_35 = arith.constant 0 : index
    %c0_36 = arith.constant 0 : index
    %c0_37 = arith.constant 0 : index
    %69 = vector.load %arg12[%c0_35, %c0_36, %c0_37] : memref<1x4x32xbf16, #tpu.memory_space<vmem>>, vector<1x4x32xbf16>
    %70 = vector.shape_cast %69 : vector<1x4x32xbf16> to vector<4x32xbf16>
    %71 = vector.shape_cast %68 : vector<4x32xbf16> to vector<1x4x32xbf16>
    tpu.vector_store %arg12[%c0_35, %c0_36, %c0_37], %71 {strides = array<i32>} : memref<1x4x32xbf16, #tpu.memory_space<vmem>>, vector<1x4x32xbf16>,
    return
  }
  func.func @transform_0(%arg0: i32) -> (i32, i32, i32) {
    %c0_i32 = arith.constant 0 : i32
    %c0_i32_0 = arith.constant 0 : i32
    %c0_i32_1 = arith.constant 0 : i32
    return %arg0, %c0_i32, %c0_i32_0 : i32, i32, i32
  }
  func.func @transform_1(%arg0: i32) -> (i32, i32) {
    %c0_i32 = arith.constant 0 : i32
    %c0_i32_0 = arith.constant 0 : i32
    %c0_i32_1 = arith.constant 0 : i32
    return %c0_i32, %c0_i32_0 : i32, i32
  }
  func.func @transform_2(%arg0: i32) -> (i32, i32) {
    %c0_i32 = arith.constant 0 : i32
    %c0_i32_0 = arith.constant 0 : i32
    %c0_i32_1 = arith.constant 0 : i32
    return %c0_i32, %c0_i32_0 : i32, i32
  }
  func.func @transform_3(%arg0: i32) -> (i32, i32) {
    %c0_i32 = arith.constant 0 : i32
    %c0_i32_0 = arith.constant 0 : i32
    %c0_i32_1 = arith.constant 0 : i32
    return %c0_i32, %c0_i32_0 : i32, i32
  }
  func.func @transform_4(%arg0: i32) -> (i32, i32) {
    %c0_i32 = arith.constant 0 : i32
    %c0_i32_0 = arith.constant 0 : i32
    %c0_i32_1 = arith.constant 0 : i32
    return %c0_i32, %c0_i32_0 : i32, i32
  }
  func.func @transform_5(%arg0: i32) -> (i32, i32) {
    %c0_i32 = arith.constant 0 : i32
    %c0_i32_0 = arith.constant 0 : i32
    %c0_i32_1 = arith.constant 0 : i32
    return %c0_i32, %c0_i32_0 : i32, i32
  }
  func.func @transform_6(%arg0: i32) -> (i32, i32) {
    %c0_i32 = arith.constant 0 : i32
    %c0_i32_0 = arith.constant 0 : i32
    %c0_i32_1 = arith.constant 0 : i32
    return %c0_i32, %c0_i32_0 : i32, i32
  }
  func.func @transform_7(%arg0: i32) -> (i32, i32) {
    %c0_i32 = arith.constant 0 : i32
    %c0_i32_0 = arith.constant 0 : i32
    %c0_i32_1 = arith.constant 0 : i32
    return %c0_i32, %c0_i32_0 : i32, i32
  }
  func.func @transform_8(%arg0: i32) -> (i32, i32) {
    %c0_i32 = arith.constant 0 : i32
    %c0_i32_0 = arith.constant 0 : i32
    %c0_i32_1 = arith.constant 0 : i32
    return %c0_i32, %c0_i32_0 : i32, i32
  }
  func.func @transform_9(%arg0: i32) -> (i32, i32, i32) {
    %c0_i32 = arith.constant 0 : i32
    %c0_i32_0 = arith.constant 0 : i32
    %c0_i32_1 = arith.constant 0 : i32
    return %arg0, %c0_i32, %c0_i32_0 : i32, i32, i32
  }
  func.func @transform_10(%arg0: i32) -> (i32, i32, i32) {
    %c0_i32 = arith.constant 0 : i32
    %c0_i32_0 = arith.constant 0 : i32
    %c0_i32_1 = arith.constant 0 : i32
    return %arg0, %c0_i32, %c0_i32_0 : i32, i32, i32
  }
  func.func @transform_11(%arg0: i32) -> (i32, i32, i32) {
    %c0_i32 = arith.constant 0 : i32
    %c0_i32_0 = arith.constant 0 : i32
    %c0_i32_1 = arith.constant 0 : i32
    return %arg0, %c0_i32, %c0_i32_0 : i32, i32, i32
  }
}

module attributes {stable_mosaic.version = 11 : i64} {
  func.func @_embed_kernel(%arg0: i32, %arg1: memref<1x4x192xbf16, #tpu.memory_space<vmem>>, %arg2: memref<192x32xbf16, #tpu.memory_space<vmem>>, %arg3: memref<1x32xf32, #tpu.memory_space<vmem>>, %arg4: memref<4x32xf32, #tpu.memory_space<vmem>>, %arg5: memref<1x32xf32, #tpu.memory_space<vmem>>, %arg6: memref<1x32xf32, #tpu.memory_space<vmem>>, %arg7: memref<1x4x32xf32, #tpu.memory_space<vmem>>) attributes {dimension_semantics = [#tpu.dimension_semantics<parallel>], iteration_bounds = array<i64: 2>, scalar_prefetch = 0 : i64, scratch_operands = 0 : i64, tpu.core_type = #tpu.core_type<tc>, window_params = [{transform_indices = @transform_0, window_bounds = array<i64: 1, 4, 192>}, {pipeline_mode = #tpu.pipeline_mode<synchronous>, transform_indices = @transform_1, window_bounds = array<i64: 192, 32>}, {pipeline_mode = #tpu.pipeline_mode<synchronous>, transform_indices = @transform_2, window_bounds = array<i64: 1, 32>}, {pipeline_mode = #tpu.pipeline_mode<synchronous>, transform_indices = @transform_3, window_bounds = array<i64: 4, 32>}, {pipeline_mode = #tpu.pipeline_mode<synchronous>, transform_indices = @transform_4, window_bounds = array<i64: 1, 32>}, {pipeline_mode = #tpu.pipeline_mode<synchronous>, transform_indices = @transform_5, window_bounds = array<i64: 1, 32>}, {transform_indices = @transform_6, window_bounds = array<i64: 1, 4, 32>}]} {
    %c0 = arith.constant 0 : index
    %c0_0 = arith.constant 0 : index
    %c0_1 = arith.constant 0 : index
    %0 = vector.load %arg1[%c0, %c0_0, %c0_1] : memref<1x4x192xbf16, #tpu.memory_space<vmem>>, vector<1x4x192xbf16>
    %1 = vector.shape_cast %0 : vector<1x4x192xbf16> to vector<4x192xbf16>
    %c0_2 = arith.constant 0 : index
    %c0_3 = arith.constant 0 : index
    %2 = vector.load %arg2[%c0_2, %c0_3] : memref<192x32xbf16, #tpu.memory_space<vmem>>, vector<192x32xbf16>
    %cst = arith.constant dense<0.000000e+00> : vector<4x32xf32>
    %3 = tpu.matmul %1, %2, %cst {dimension_numbers = #tpu.dot_dimension_numbers<[1], [0], [0], [1], [0, 0, 1, 1], [], []>} : vector<4x192xbf16>, vector<192x32xbf16>, vector<4x32xf32> -> vector<4x32xf32>
    %c0_4 = arith.constant 0 : index
    %c0_5 = arith.constant 0 : index
    %4 = vector.load %arg3[%c0_4, %c0_5] : memref<1x32xf32, #tpu.memory_space<vmem>>, vector<1x32xf32>
    %5 = vector.broadcast %4 : vector<1x32xf32> to vector<4x32xf32>
    %6 = arith.addf %3, %5 : vector<4x32xf32>
    %c0_6 = arith.constant 0 : index
    %c0_7 = arith.constant 0 : index
    %7 = vector.load %arg4[%c0_6, %c0_7] : memref<4x32xf32, #tpu.memory_space<vmem>>, vector<4x32xf32>
    %8 = arith.addf %6, %7 : vector<4x32xf32>
    %c0_8 = arith.constant 0 : index
    %c0_9 = arith.constant 0 : index
    %9 = vector.load %arg5[%c0_8, %c0_9] : memref<1x32xf32, #tpu.memory_space<vmem>>, vector<1x32xf32>
    %c0_10 = arith.constant 0 : index
    %c0_11 = arith.constant 0 : index
    %10 = vector.load %arg6[%c0_10, %c0_11] : memref<1x32xf32, #tpu.memory_space<vmem>>, vector<1x32xf32>
    %cst_12 = arith.constant dense<0.000000e+00> : vector<4xf32>
    %11 = vector.multi_reduction <add>, %8, %cst_12 [1] : vector<4x32xf32> to vector<4xf32>
    %12 = vector.shape_cast %11 : vector<4xf32> to vector<4x1xf32>
    %cst_13 = arith.constant 3.200000e+01 : f32
    %13 = vector.broadcast %cst_13 : f32 to vector<4x1xf32>
    %14 = arith.divf %12, %13 : vector<4x1xf32>
    %15 = vector.broadcast %14 : vector<4x1xf32> to vector<4x32xf32>
    %16 = arith.subf %8, %15 : vector<4x32xf32>
    %17 = arith.mulf %16, %16 : vector<4x32xf32>
    %cst_14 = arith.constant dense<0.000000e+00> : vector<4xf32>
    %18 = vector.multi_reduction <add>, %17, %cst_14 [1] : vector<4x32xf32> to vector<4xf32>
    %19 = vector.shape_cast %18 : vector<4xf32> to vector<4x1xf32>
    %cst_15 = arith.constant 3.200000e+01 : f32
    %20 = vector.broadcast %cst_15 : f32 to vector<4x1xf32>
    %21 = arith.divf %19, %20 : vector<4x1xf32>
    %cst_16 = arith.constant 9.99999974E-6 : f32
    %22 = vector.broadcast %cst_16 : f32 to vector<4x1xf32>
    %23 = arith.addf %21, %22 : vector<4x1xf32>
    %24 = math.rsqrt %23 : vector<4x1xf32>
    %25 = vector.broadcast %24 : vector<4x1xf32> to vector<4x32xf32>
    %26 = arith.mulf %16, %25 : vector<4x32xf32>
    %27 = vector.broadcast %9 : vector<1x32xf32> to vector<4x32xf32>
    %28 = arith.mulf %26, %27 : vector<4x32xf32>
    %29 = vector.broadcast %10 : vector<1x32xf32> to vector<4x32xf32>
    %30 = arith.addf %28, %29 : vector<4x32xf32>
    %c0_17 = arith.constant 0 : index
    %c0_18 = arith.constant 0 : index
    %c0_19 = arith.constant 0 : index
    %31 = vector.load %arg7[%c0_17, %c0_18, %c0_19] : memref<1x4x32xf32, #tpu.memory_space<vmem>>, vector<1x4x32xf32>
    %32 = vector.shape_cast %31 : vector<1x4x32xf32> to vector<4x32xf32>
    %33 = vector.shape_cast %30 : vector<4x32xf32> to vector<1x4x32xf32>
    tpu.vector_store %arg7[%c0_17, %c0_18, %c0_19], %33 {strides = array<i32>} : memref<1x4x32xf32, #tpu.memory_space<vmem>>, vector<1x4x32xf32>,
    return
  }
  func.func @transform_0(%arg0: i32) -> (i32, i32, i32) {
    %c0_i32 = arith.constant 0 : i32
    %c0_i32_0 = arith.constant 0 : i32
    %c0_i32_1 = arith.constant 0 : i32
    return %arg0, %c0_i32, %c0_i32_0 : i32, i32, i32
  }
  func.func @transform_1(%arg0: i32) -> (i32, i32) {
    %c0_i32 = arith.constant 0 : i32
    %c0_i32_0 = arith.constant 0 : i32
    %c0_i32_1 = arith.constant 0 : i32
    return %c0_i32, %c0_i32_0 : i32, i32
  }
  func.func @transform_2(%arg0: i32) -> (i32, i32) {
    %c0_i32 = arith.constant 0 : i32
    %c0_i32_0 = arith.constant 0 : i32
    %c0_i32_1 = arith.constant 0 : i32
    return %c0_i32, %c0_i32_0 : i32, i32
  }
  func.func @transform_3(%arg0: i32) -> (i32, i32) {
    %c0_i32 = arith.constant 0 : i32
    %c0_i32_0 = arith.constant 0 : i32
    %c0_i32_1 = arith.constant 0 : i32
    return %c0_i32, %c0_i32_0 : i32, i32
  }
  func.func @transform_4(%arg0: i32) -> (i32, i32) {
    %c0_i32 = arith.constant 0 : i32
    %c0_i32_0 = arith.constant 0 : i32
    %c0_i32_1 = arith.constant 0 : i32
    return %c0_i32, %c0_i32_0 : i32, i32
  }
  func.func @transform_5(%arg0: i32) -> (i32, i32) {
    %c0_i32 = arith.constant 0 : i32
    %c0_i32_0 = arith.constant 0 : i32
    %c0_i32_1 = arith.constant 0 : i32
    return %c0_i32, %c0_i32_0 : i32, i32
  }
  func.func @transform_6(%arg0: i32) -> (i32, i32, i32) {
    %c0_i32 = arith.constant 0 : i32
    %c0_i32_0 = arith.constant 0 : i32
    %c0_i32_1 = arith.constant 0 : i32
    return %arg0, %c0_i32, %c0_i32_0 : i32, i32, i32
  }
}

module attributes {stable_mosaic.version = 11 : i64} {
  func.func @_wkv_kernel(%arg0: i32, %arg1: i32, %arg2: memref<1x32xf32, #tpu.memory_space<vmem>>, %arg3: memref<1x32xf32, #tpu.memory_space<vmem>>, %arg4: memref<4x2x32xbf16, #tpu.memory_space<vmem>>, %arg5: memref<4x2x32xbf16, #tpu.memory_space<vmem>>, %arg6: memref<4x2x32xbf16, #tpu.memory_space<vmem>>, %arg7: memref<2x32xf32, #tpu.memory_space<vmem>>, %arg8: memref<2x32xf32, #tpu.memory_space<vmem>>, %arg9: memref<2x32xf32, #tpu.memory_space<vmem>>) attributes {dimension_semantics = [#tpu.dimension_semantics<parallel>, #tpu.dimension_semantics<arbitrary>], iteration_bounds = array<i64: 1, 1>, scalar_prefetch = 0 : i64, scratch_operands = 3 : i64, tpu.core_type = #tpu.core_type<tc>, window_params = [{transform_indices = @transform_0, window_bounds = array<i64: 1, 32>}, {transform_indices = @transform_1, window_bounds = array<i64: 1, 32>}, {transform_indices = @transform_2, window_bounds = array<i64: 4, 2, 32>}, {transform_indices = @transform_3, window_bounds = array<i64: 4, 2, 32>}, {transform_indices = @transform_4, window_bounds = array<i64: 4, 2, 32>}]} {
    %c0_i32 = arith.constant 0 : i32
    %0 = arith.cmpi eq, %arg1, %c0_i32 : i32
    %1 = arith.extui %0 : i1 to i32
    %c0_i32_0 = arith.constant 0 : i32
    %2 = arith.cmpi ne, %1, %c0_i32_0 : i32
    scf.if %2 {
      %cst = arith.constant 0.000000e+00 : f32
      %163 = vector.broadcast %cst : f32 to vector<2x32xf32>
      %c0_41 = arith.constant 0 : index
      %c0_42 = arith.constant 0 : index
      %164 = vector.load %arg7[%c0_41, %c0_42] : memref<2x32xf32, #tpu.memory_space<vmem>>, vector<2x32xf32>
      tpu.vector_store %arg7[%c0_41, %c0_42], %163 {strides = array<i32>} : memref<2x32xf32, #tpu.memory_space<vmem>>, vector<2x32xf32>,
      %cst_43 = arith.constant 0.000000e+00 : f32
      %165 = vector.broadcast %cst_43 : f32 to vector<2x32xf32>
      %c0_44 = arith.constant 0 : index
      %c0_45 = arith.constant 0 : index
      %166 = vector.load %arg8[%c0_44, %c0_45] : memref<2x32xf32, #tpu.memory_space<vmem>>, vector<2x32xf32>
      tpu.vector_store %arg8[%c0_44, %c0_45], %165 {strides = array<i32>} : memref<2x32xf32, #tpu.memory_space<vmem>>, vector<2x32xf32>,
      %cst_46 = arith.constant -9.99999968E+37 : f32
      %167 = vector.broadcast %cst_46 : f32 to vector<2x32xf32>
      %c0_47 = arith.constant 0 : index
      %c0_48 = arith.constant 0 : index
      %168 = vector.load %arg9[%c0_47, %c0_48] : memref<2x32xf32, #tpu.memory_space<vmem>>, vector<2x32xf32>
      tpu.vector_store %arg9[%c0_47, %c0_48], %167 {strides = array<i32>} : memref<2x32xf32, #tpu.memory_space<vmem>>, vector<2x32xf32>,
    } else {
    }
    %c0 = arith.constant 0 : index
    %c0_1 = arith.constant 0 : index
    %3 = vector.load %arg2[%c0, %c0_1] : memref<1x32xf32, #tpu.memory_space<vmem>>, vector<1x32xf32>
    %c0_2 = arith.constant 0 : index
    %c0_3 = arith.constant 0 : index
    %4 = vector.load %arg3[%c0_2, %c0_3] : memref<1x32xf32, #tpu.memory_space<vmem>>, vector<1x32xf32>
    %c0_4 = arith.constant 0 : index
    %c0_5 = arith.constant 0 : index
    %5 = vector.load %arg7[%c0_4, %c0_5] : memref<2x32xf32, #tpu.memory_space<vmem>>, vector<2x32xf32>
    %c0_6 = arith.constant 0 : index
    %c0_7 = arith.constant 0 : index
    %6 = vector.load %arg8[%c0_6, %c0_7] : memref<2x32xf32, #tpu.memory_space<vmem>>, vector<2x32xf32>
    %c0_8 = arith.constant 0 : index
    %c0_9 = arith.constant 0 : index
    %7 = vector.load %arg9[%c0_8, %c0_9] : memref<2x32xf32, #tpu.memory_space<vmem>>, vector<2x32xf32>
    %c0_i32_10 = arith.constant 0 : i32
    %8 = arith.index_cast %c0_i32_10 : i32 to index
    %c0_11 = arith.constant 0 : index
    %c0_12 = arith.constant 0 : index
    %9 = vector.load %arg4[%8, %c0_11, %c0_12] : memref<4x2x32xbf16, #tpu.memory_space<vmem>>, vector<1x2x32xbf16>
    %10 = vector.shape_cast %9 : vector<1x2x32xbf16> to vector<2x32xbf16>
    %11 = arith.extf %10 : vector<2x32xbf16> to vector<2x32xf32>
    %12 = arith.index_cast %c0_i32_10 : i32 to index
    %c0_13 = arith.constant 0 : index
    %c0_14 = arith.constant 0 : index
    %13 = vector.load %arg5[%12, %c0_13, %c0_14] : memref<4x2x32xbf16, #tpu.memory_space<vmem>>, vector<1x2x32xbf16>
    %14 = vector.shape_cast %13 : vector<1x2x32xbf16> to vector<2x32xbf16>
    %15 = arith.extf %14 : vector<2x32xbf16> to vector<2x32xf32>
    %16 = vector.broadcast %4 : vector<1x32xf32> to vector<2x32xf32>
    %17 = arith.addf %16, %11 : vector<2x32xf32>
    %18 = arith.maximumf %7, %17 : vector<2x32xf32>
    %19 = arith.subf %7, %18 : vector<2x32xf32>
    %20 = math.exp %19 : vector<2x32xf32>
    %21 = arith.subf %17, %18 : vector<2x32xf32>
    %22 = math.exp %21 : vector<2x32xf32>
    %23 = arith.mulf %20, %5 : vector<2x32xf32>
    %24 = arith.mulf %22, %15 : vector<2x32xf32>
    %25 = arith.addf %23, %24 : vector<2x32xf32>
    %26 = arith.mulf %20, %6 : vector<2x32xf32>
    %27 = arith.addf %26, %22 : vector<2x32xf32>
    %28 = arith.divf %25, %27 : vector<2x32xf32>
    %29 = arith.truncf %28 : vector<2x32xf32> to vector<2x32xbf16>
    %30 = arith.index_cast %c0_i32_10 : i32 to index
    %c0_15 = arith.constant 0 : index
    %c0_16 = arith.constant 0 : index
    %31 = vector.load %arg6[%30, %c0_15, %c0_16] : memref<4x2x32xbf16, #tpu.memory_space<vmem>>, vector<1x2x32xbf16>
    %32 = vector.shape_cast %31 : vector<1x2x32xbf16> to vector<2x32xbf16>
    %33 = vector.shape_cast %29 : vector<2x32xbf16> to vector<1x2x32xbf16>
    tpu.vector_store %arg6[%30, %c0_15, %c0_16], %33 {strides = array<i32>} : memref<4x2x32xbf16, #tpu.memory_space<vmem>>, vector<1x2x32xbf16>,
    %34 = vector.broadcast %3 : vector<1x32xf32> to vector<2x32xf32>
    %35 = arith.addf %34, %7 : vector<2x32xf32>
    %36 = arith.maximumf %35, %11 : vector<2x32xf32>
    %37 = arith.subf %35, %36 : vector<2x32xf32>
    %38 = math.exp %37 : vector<2x32xf32>
    %39 = arith.subf %11, %36 : vector<2x32xf32>
    %40 = math.exp %39 : vector<2x32xf32>
    %41 = arith.mulf %38, %5 : vector<2x32xf32>
    %42 = arith.mulf %40, %15 : vector<2x32xf32>
    %43 = arith.addf %41, %42 : vector<2x32xf32>
    %44 = arith.mulf %38, %6 : vector<2x32xf32>
    %45 = arith.addf %44, %40 : vector<2x32xf32>
    %c1_i32 = arith.constant 1 : i32
    %46 = arith.index_cast %c1_i32 : i32 to index
    %c0_17 = arith.constant 0 : index
    %c0_18 = arith.constant 0 : index
    %47 = vector.load %arg4[%46, %c0_17, %c0_18] : memref<4x2x32xbf16, #tpu.memory_space<vmem>>, vector<1x2x32xbf16>
    %48 = vector.shape_cast %47 : vector<1x2x32xbf16> to vector<2x32xbf16>
    %49 = arith.extf %48 : vector<2x32xbf16> to vector<2x32xf32>
    %50 = arith.index_cast %c1_i32 : i32 to index
    %c0_19 = arith.constant 0 : index
    %c0_20 = arith.constant 0 : index
    %51 = vector.load %arg5[%50, %c0_19, %c0_20] : memref<4x2x32xbf16, #tpu.memory_space<vmem>>, vector<1x2x32xbf16>
    %52 = vector.shape_cast %51 : vector<1x2x32xbf16> to vector<2x32xbf16>
    %53 = arith.extf %52 : vector<2x32xbf16> to vector<2x32xf32>
    %54 = vector.broadcast %4 : vector<1x32xf32> to vector<2x32xf32>
    %55 = arith.addf %54, %49 : vector<2x32xf32>
    %56 = arith.maximumf %36, %55 : vector<2x32xf32>
    %57 = arith.subf %36, %56 : vector<2x32xf32>
    %58 = math.exp %57 : vector<2x32xf32>
    %59 = arith.subf %55, %56 : vector<2x32xf32>
    %60 = math.exp %59 : vector<2x32xf32>
    %61 = arith.mulf %58, %43 : vector<2x32xf32>
    %62 = arith.mulf %60, %53 : vector<2x32xf32>
    %63 = arith.addf %61, %62 : vector<2x32xf32>
    %64 = arith.mulf %58, %45 : vector<2x32xf32>
    %65 = arith.addf %64, %60 : vector<2x32xf32>
    %66 = arith.divf %63, %65 : vector<2x32xf32>
    %67 = arith.truncf %66 : vector<2x32xf32> to vector<2x32xbf16>
    %68 = arith.index_cast %c1_i32 : i32 to index
    %c0_21 = arith.constant 0 : index
    %c0_22 = arith.constant 0 : index
    %69 = vector.load %arg6[%68, %c0_21, %c0_22] : memref<4x2x32xbf16, #tpu.memory_space<vmem>>, vector<1x2x32xbf16>
    %70 = vector.shape_cast %69 : vector<1x2x32xbf16> to vector<2x32xbf16>
    %71 = vector.shape_cast %67 : vector<2x32xbf16> to vector<1x2x32xbf16>
    tpu.vector_store %arg6[%68, %c0_21, %c0_22], %71 {strides = array<i32>} : memref<4x2x32xbf16, #tpu.memory_space<vmem>>, vector<1x2x32xbf16>,
    %72 = vector.broadcast %3 : vector<1x32xf32> to vector<2x32xf32>
    %73 = arith.addf %72, %36 : vector<2x32xf32>
    %74 = arith.maximumf %73, %49 : vector<2x32xf32>
    %75 = arith.subf %73, %74 : vector<2x32xf32>
    %76 = math.exp %75 : vector<2x32xf32>
    %77 = arith.subf %49, %74 : vector<2x32xf32>
    %78 = math.exp %77 : vector<2x32xf32>
    %79 = arith.mulf %76, %43 : vector<2x32xf32>
    %80 = arith.mulf %78, %53 : vector<2x32xf32>
    %81 = arith.addf %79, %80 : vector<2x32xf32>
    %82 = arith.mulf %76, %45 : vector<2x32xf32>
    %83 = arith.addf %82, %78 : vector<2x32xf32>
    %c2_i32 = arith.constant 2 : i32
    %84 = arith.index_cast %c2_i32 : i32 to index
    %c0_23 = arith.constant 0 : index
    %c0_24 = arith.constant 0 : index
    %85 = vector.load %arg4[%84, %c0_23, %c0_24] : memref<4x2x32xbf16, #tpu.memory_space<vmem>>, vector<1x2x32xbf16>
    %86 = vector.shape_cast %85 : vector<1x2x32xbf16> to vector<2x32xbf16>
    %87 = arith.extf %86 : vector<2x32xbf16> to vector<2x32xf32>
    %88 = arith.index_cast %c2_i32 : i32 to index
    %c0_25 = arith.constant 0 : index
    %c0_26 = arith.constant 0 : index
    %89 = vector.load %arg5[%88, %c0_25, %c0_26] : memref<4x2x32xbf16, #tpu.memory_space<vmem>>, vector<1x2x32xbf16>
    %90 = vector.shape_cast %89 : vector<1x2x32xbf16> to vector<2x32xbf16>
    %91 = arith.extf %90 : vector<2x32xbf16> to vector<2x32xf32>
    %92 = vector.broadcast %4 : vector<1x32xf32> to vector<2x32xf32>
    %93 = arith.addf %92, %87 : vector<2x32xf32>
    %94 = arith.maximumf %74, %93 : vector<2x32xf32>
    %95 = arith.subf %74, %94 : vector<2x32xf32>
    %96 = math.exp %95 : vector<2x32xf32>
    %97 = arith.subf %93, %94 : vector<2x32xf32>
    %98 = math.exp %97 : vector<2x32xf32>
    %99 = arith.mulf %96, %81 : vector<2x32xf32>
    %100 = arith.mulf %98, %91 : vector<2x32xf32>
    %101 = arith.addf %99, %100 : vector<2x32xf32>
    %102 = arith.mulf %96, %83 : vector<2x32xf32>
    %103 = arith.addf %102, %98 : vector<2x32xf32>
    %104 = arith.divf %101, %103 : vector<2x32xf32>
    %105 = arith.truncf %104 : vector<2x32xf32> to vector<2x32xbf16>
    %106 = arith.index_cast %c2_i32 : i32 to index
    %c0_27 = arith.constant 0 : index
    %c0_28 = arith.constant 0 : index
    %107 = vector.load %arg6[%106, %c0_27, %c0_28] : memref<4x2x32xbf16, #tpu.memory_space<vmem>>, vector<1x2x32xbf16>
    %108 = vector.shape_cast %107 : vector<1x2x32xbf16> to vector<2x32xbf16>
    %109 = vector.shape_cast %105 : vector<2x32xbf16> to vector<1x2x32xbf16>
    tpu.vector_store %arg6[%106, %c0_27, %c0_28], %109 {strides = array<i32>} : memref<4x2x32xbf16, #tpu.memory_space<vmem>>, vector<1x2x32xbf16>,
    %110 = vector.broadcast %3 : vector<1x32xf32> to vector<2x32xf32>
    %111 = arith.addf %110, %74 : vector<2x32xf32>
    %112 = arith.maximumf %111, %87 : vector<2x32xf32>
    %113 = arith.subf %111, %112 : vector<2x32xf32>
    %114 = math.exp %113 : vector<2x32xf32>
    %115 = arith.subf %87, %112 : vector<2x32xf32>
    %116 = math.exp %115 : vector<2x32xf32>
    %117 = arith.mulf %114, %81 : vector<2x32xf32>
    %118 = arith.mulf %116, %91 : vector<2x32xf32>
    %119 = arith.addf %117, %118 : vector<2x32xf32>
    %120 = arith.mulf %114, %83 : vector<2x32xf32>
    %121 = arith.addf %120, %116 : vector<2x32xf32>
    %c3_i32 = arith.constant 3 : i32
    %122 = arith.index_cast %c3_i32 : i32 to index
    %c0_29 = arith.constant 0 : index
    %c0_30 = arith.constant 0 : index
    %123 = vector.load %arg4[%122, %c0_29, %c0_30] : memref<4x2x32xbf16, #tpu.memory_space<vmem>>, vector<1x2x32xbf16>
    %124 = vector.shape_cast %123 : vector<1x2x32xbf16> to vector<2x32xbf16>
    %125 = arith.extf %124 : vector<2x32xbf16> to vector<2x32xf32>
    %126 = arith.index_cast %c3_i32 : i32 to index
    %c0_31 = arith.constant 0 : index
    %c0_32 = arith.constant 0 : index
    %127 = vector.load %arg5[%126, %c0_31, %c0_32] : memref<4x2x32xbf16, #tpu.memory_space<vmem>>, vector<1x2x32xbf16>
    %128 = vector.shape_cast %127 : vector<1x2x32xbf16> to vector<2x32xbf16>
    %129 = arith.extf %128 : vector<2x32xbf16> to vector<2x32xf32>
    %130 = vector.broadcast %4 : vector<1x32xf32> to vector<2x32xf32>
    %131 = arith.addf %130, %125 : vector<2x32xf32>
    %132 = arith.maximumf %112, %131 : vector<2x32xf32>
    %133 = arith.subf %112, %132 : vector<2x32xf32>
    %134 = math.exp %133 : vector<2x32xf32>
    %135 = arith.subf %131, %132 : vector<2x32xf32>
    %136 = math.exp %135 : vector<2x32xf32>
    %137 = arith.mulf %134, %119 : vector<2x32xf32>
    %138 = arith.mulf %136, %129 : vector<2x32xf32>
    %139 = arith.addf %137, %138 : vector<2x32xf32>
    %140 = arith.mulf %134, %121 : vector<2x32xf32>
    %141 = arith.addf %140, %136 : vector<2x32xf32>
    %142 = arith.divf %139, %141 : vector<2x32xf32>
    %143 = arith.truncf %142 : vector<2x32xf32> to vector<2x32xbf16>
    %144 = arith.index_cast %c3_i32 : i32 to index
    %c0_33 = arith.constant 0 : index
    %c0_34 = arith.constant 0 : index
    %145 = vector.load %arg6[%144, %c0_33, %c0_34] : memref<4x2x32xbf16, #tpu.memory_space<vmem>>, vector<1x2x32xbf16>
    %146 = vector.shape_cast %145 : vector<1x2x32xbf16> to vector<2x32xbf16>
    %147 = vector.shape_cast %143 : vector<2x32xbf16> to vector<1x2x32xbf16>
    tpu.vector_store %arg6[%144, %c0_33, %c0_34], %147 {strides = array<i32>} : memref<4x2x32xbf16, #tpu.memory_space<vmem>>, vector<1x2x32xbf16>,
    %148 = vector.broadcast %3 : vector<1x32xf32> to vector<2x32xf32>
    %149 = arith.addf %148, %112 : vector<2x32xf32>
    %150 = arith.maximumf %149, %125 : vector<2x32xf32>
    %151 = arith.subf %149, %150 : vector<2x32xf32>
    %152 = math.exp %151 : vector<2x32xf32>
    %153 = arith.subf %125, %150 : vector<2x32xf32>
    %154 = math.exp %153 : vector<2x32xf32>
    %155 = arith.mulf %152, %119 : vector<2x32xf32>
    %156 = arith.mulf %154, %129 : vector<2x32xf32>
    %157 = arith.addf %155, %156 : vector<2x32xf32>
    %158 = arith.mulf %152, %121 : vector<2x32xf32>
    %159 = arith.addf %158, %154 : vector<2x32xf32>
    %c4_i32 = arith.constant 4 : i32
    %c0_35 = arith.constant 0 : index
    %c0_36 = arith.constant 0 : index
    %160 = vector.load %arg7[%c0_35, %c0_36] : memref<2x32xf32, #tpu.memory_space<vmem>>, vector<2x32xf32>
    tpu.vector_store %arg7[%c0_35, %c0_36], %157 {strides = array<i32>} : memref<2x32xf32, #tpu.memory_space<vmem>>, vector<2x32xf32>,
    %c0_37 = arith.constant 0 : index
    %c0_38 = arith.constant 0 : index
    %161 = vector.load %arg8[%c0_37, %c0_38] : memref<2x32xf32, #tpu.memory_space<vmem>>, vector<2x32xf32>
    tpu.vector_store %arg8[%c0_37, %c0_38], %159 {strides = array<i32>} : memref<2x32xf32, #tpu.memory_space<vmem>>, vector<2x32xf32>,
    %c0_39 = arith.constant 0 : index
    %c0_40 = arith.constant 0 : index
    %162 = vector.load %arg9[%c0_39, %c0_40] : memref<2x32xf32, #tpu.memory_space<vmem>>, vector<2x32xf32>
    tpu.vector_store %arg9[%c0_39, %c0_40], %150 {strides = array<i32>} : memref<2x32xf32, #tpu.memory_space<vmem>>, vector<2x32xf32>,
    return
  }
  func.func @transform_0(%arg0: i32, %arg1: i32) -> (i32, i32) {
    %c0_i32 = arith.constant 0 : i32
    %c0_i32_0 = arith.constant 0 : i32
    return %c0_i32, %arg0 : i32, i32
  }
  func.func @transform_1(%arg0: i32, %arg1: i32) -> (i32, i32) {
    %c0_i32 = arith.constant 0 : i32
    %c0_i32_0 = arith.constant 0 : i32
    return %c0_i32, %arg0 : i32, i32
  }
  func.func @transform_2(%arg0: i32, %arg1: i32) -> (i32, i32, i32) {
    %c0_i32 = arith.constant 0 : i32
    %c0_i32_0 = arith.constant 0 : i32
    return %arg1, %c0_i32, %arg0 : i32, i32, i32
  }
  func.func @transform_3(%arg0: i32, %arg1: i32) -> (i32, i32, i32) {
    %c0_i32 = arith.constant 0 : i32
    %c0_i32_0 = arith.constant 0 : i32
    return %arg1, %c0_i32, %arg0 : i32, i32, i32
  }
  func.func @transform_4(%arg0: i32, %arg1: i32) -> (i32, i32, i32) {
    %c0_i32 = arith.constant 0 : i32
    %c0_i32_0 = arith.constant 0 : i32
    return %arg1, %c0_i32, %arg0 : i32, i32, i32
  }
}

module attributes {stable_mosaic.version = 11 : i64} {
  func.func @_tm_post_cm_pre_kernel(%arg0: i32, %arg1: memref<1x4x32xbf16, #tpu.memory_space<vmem>>, %arg2: memref<1x4x32xbf16, #tpu.memory_space<vmem>>, %arg3: memref<32x32xbf16, #tpu.memory_space<vmem>>, %arg4: memref<1x4x32xf32, #tpu.memory_space<vmem>>, %arg5: memref<1x32xf32, #tpu.memory_space<vmem>>, %arg6: memref<1x32xf32, #tpu.memory_space<vmem>>, %arg7: memref<1x32xf32, #tpu.memory_space<vmem>>, %arg8: memref<1x32xf32, #tpu.memory_space<vmem>>, %arg9: memref<32x64xbf16, #tpu.memory_space<vmem>>, %arg10: memref<32x32xbf16, #tpu.memory_space<vmem>>, %arg11: memref<1x4x32xf32, #tpu.memory_space<vmem>>, %arg12: memref<1x4x64xbf16, #tpu.memory_space<vmem>>, %arg13: memref<1x4x32xbf16, #tpu.memory_space<vmem>>) attributes {dimension_semantics = [#tpu.dimension_semantics<parallel>], iteration_bounds = array<i64: 2>, scalar_prefetch = 0 : i64, scratch_operands = 0 : i64, tpu.core_type = #tpu.core_type<tc>, window_params = [{transform_indices = @transform_0, window_bounds = array<i64: 1, 4, 32>}, {transform_indices = @transform_1, window_bounds = array<i64: 1, 4, 32>}, {pipeline_mode = #tpu.pipeline_mode<synchronous>, transform_indices = @transform_2, window_bounds = array<i64: 32, 32>}, {transform_indices = @transform_3, window_bounds = array<i64: 1, 4, 32>}, {pipeline_mode = #tpu.pipeline_mode<synchronous>, transform_indices = @transform_4, window_bounds = array<i64: 1, 32>}, {pipeline_mode = #tpu.pipeline_mode<synchronous>, transform_indices = @transform_5, window_bounds = array<i64: 1, 32>}, {pipeline_mode = #tpu.pipeline_mode<synchronous>, transform_indices = @transform_6, window_bounds = array<i64: 1, 32>}, {pipeline_mode = #tpu.pipeline_mode<synchronous>, transform_indices = @transform_7, window_bounds = array<i64: 1, 32>}, {pipeline_mode = #tpu.pipeline_mode<synchronous>, transform_indices = @transform_8, window_bounds = array<i64: 32, 64>}, {pipeline_mode = #tpu.pipeline_mode<synchronous>, transform_indices = @transform_9, window_bounds = array<i64: 32, 32>}, {transform_indices = @transform_10, window_bounds = array<i64: 1, 4, 32>}, {transform_indices = @transform_11, window_bounds = array<i64: 1, 4, 64>}, {transform_indices = @transform_12, window_bounds = array<i64: 1, 4, 32>}]} {
    %c0 = arith.constant 0 : index
    %c0_0 = arith.constant 0 : index
    %c0_1 = arith.constant 0 : index
    %0 = vector.load %arg1[%c0, %c0_0, %c0_1] : memref<1x4x32xbf16, #tpu.memory_space<vmem>>, vector<1x4x32xbf16>
    %1 = vector.shape_cast %0 : vector<1x4x32xbf16> to vector<4x32xbf16>
    %2 = arith.extf %1 : vector<4x32xbf16> to vector<4x32xf32>
    %3 = arith.negf %2 : vector<4x32xf32>
    %4 = math.exp %3 : vector<4x32xf32>
    %cst = arith.constant 1.000000e+00 : f32
    %5 = vector.broadcast %cst : f32 to vector<4x32xf32>
    %6 = arith.addf %5, %4 : vector<4x32xf32>
    %7 = arith.divf %5, %6 : vector<4x32xf32>
    %c0_2 = arith.constant 0 : index
    %c0_3 = arith.constant 0 : index
    %c0_4 = arith.constant 0 : index
    %8 = vector.load %arg2[%c0_2, %c0_3, %c0_4] : memref<1x4x32xbf16, #tpu.memory_space<vmem>>, vector<1x4x32xbf16>
    %9 = vector.shape_cast %8 : vector<1x4x32xbf16> to vector<4x32xbf16>
    %10 = arith.extf %9 : vector<4x32xbf16> to vector<4x32xf32>
    %11 = arith.mulf %7, %10 : vector<4x32xf32>
    %12 = arith.truncf %11 : vector<4x32xf32> to vector<4x32xbf16>
    %c0_5 = arith.constant 0 : index
    %c0_6 = arith.constant 0 : index
    %c0_7 = arith.constant 0 : index
    %13 = vector.load %arg4[%c0_5, %c0_6, %c0_7] : memref<1x4x32xf32, #tpu.memory_space<vmem>>, vector<1x4x32xf32>
    %14 = vector.shape_cast %13 : vector<1x4x32xf32> to vector<4x32xf32>
    %c0_8 = arith.constant 0 : index
    %c0_9 = arith.constant 0 : index
    %15 = vector.load %arg3[%c0_8, %c0_9] : memref<32x32xbf16, #tpu.memory_space<vmem>>, vector<32x32xbf16>
    %cst_10 = arith.constant dense<0.000000e+00> : vector<4x32xf32>
    %16 = tpu.matmul %12, %15, %cst_10 {dimension_numbers = #tpu.dot_dimension_numbers<[1], [0], [0], [1], [0, 0, 1, 1], [], []>} : vector<4x32xbf16>, vector<32x32xbf16>, vector<4x32xf32> -> vector<4x32xf32>
    %17 = arith.addf %14, %16 : vector<4x32xf32>
    %c0_11 = arith.constant 0 : index
    %c0_12 = arith.constant 0 : index
    %c0_13 = arith.constant 0 : index
    %18 = vector.load %arg11[%c0_11, %c0_12, %c0_13] : memref<1x4x32xf32, #tpu.memory_space<vmem>>, vector<1x4x32xf32>
    %19 = vector.shape_cast %18 : vector<1x4x32xf32> to vector<4x32xf32>
    %20 = vector.shape_cast %17 : vector<4x32xf32> to vector<1x4x32xf32>
    tpu.vector_store %arg11[%c0_11, %c0_12, %c0_13], %20 {strides = array<i32>} : memref<1x4x32xf32, #tpu.memory_space<vmem>>, vector<1x4x32xf32>,
    %c0_14 = arith.constant 0 : index
    %c0_15 = arith.constant 0 : index
    %21 = vector.load %arg5[%c0_14, %c0_15] : memref<1x32xf32, #tpu.memory_space<vmem>>, vector<1x32xf32>
    %c0_16 = arith.constant 0 : index
    %c0_17 = arith.constant 0 : index
    %22 = vector.load %arg6[%c0_16, %c0_17] : memref<1x32xf32, #tpu.memory_space<vmem>>, vector<1x32xf32>
    %cst_18 = arith.constant dense<0.000000e+00> : vector<4xf32>
    %23 = vector.multi_reduction <add>, %17, %cst_18 [1] : vector<4x32xf32> to vector<4xf32>
    %24 = vector.shape_cast %23 : vector<4xf32> to vector<4x1xf32>
    %cst_19 = arith.constant 3.200000e+01 : f32
    %25 = vector.broadcast %cst_19 : f32 to vector<4x1xf32>
    %26 = arith.divf %24, %25 : vector<4x1xf32>
    %27 = vector.broadcast %26 : vector<4x1xf32> to vector<4x32xf32>
    %28 = arith.subf %17, %27 : vector<4x32xf32>
    %29 = arith.mulf %28, %28 : vector<4x32xf32>
    %cst_20 = arith.constant dense<0.000000e+00> : vector<4xf32>
    %30 = vector.multi_reduction <add>, %29, %cst_20 [1] : vector<4x32xf32> to vector<4xf32>
    %31 = vector.shape_cast %30 : vector<4xf32> to vector<4x1xf32>
    %cst_21 = arith.constant 3.200000e+01 : f32
    %32 = vector.broadcast %cst_21 : f32 to vector<4x1xf32>
    %33 = arith.divf %31, %32 : vector<4x1xf32>
    %cst_22 = arith.constant 9.99999997E-7 : f32
    %34 = vector.broadcast %cst_22 : f32 to vector<4x1xf32>
    %35 = arith.addf %33, %34 : vector<4x1xf32>
    %36 = math.rsqrt %35 : vector<4x1xf32>
    %37 = vector.broadcast %36 : vector<4x1xf32> to vector<4x32xf32>
    %38 = arith.mulf %28, %37 : vector<4x32xf32>
    %39 = vector.broadcast %21 : vector<1x32xf32> to vector<4x32xf32>
    %40 = arith.mulf %38, %39 : vector<4x32xf32>
    %41 = vector.broadcast %22 : vector<1x32xf32> to vector<4x32xf32>
    %42 = arith.addf %40, %41 : vector<4x32xf32>
    %cst_23 = arith.constant 0.000000e+00 : f32
    %43 = vector.broadcast %cst_23 : f32 to vector<1x32xf32>
    %44 = vector.extract_strided_slice %42 {offsets = [0, 0], sizes = [3, 32], strides = [1, 1]} : vector<4x32xf32> to vector<3x32xf32>
    %45 = tpu.concatenate %43, %44 in 0 : vector<1x32xf32>, vector<3x32xf32> -> vector<4x32xf32>
    %c0_24 = arith.constant 0 : index
    %c0_25 = arith.constant 0 : index
    %46 = vector.load %arg7[%c0_24, %c0_25] : memref<1x32xf32, #tpu.memory_space<vmem>>, vector<1x32xf32>
    %c0_26 = arith.constant 0 : index
    %c0_27 = arith.constant 0 : index
    %47 = vector.load %arg8[%c0_26, %c0_27] : memref<1x32xf32, #tpu.memory_space<vmem>>, vector<1x32xf32>
    %48 = vector.broadcast %46 : vector<1x32xf32> to vector<4x32xf32>
    %49 = arith.mulf %42, %48 : vector<4x32xf32>
    %cst_28 = arith.constant 1.000000e+00 : f32
    %50 = vector.broadcast %cst_28 : f32 to vector<1x32xf32>
    %51 = arith.subf %50, %46 : vector<1x32xf32>
    %52 = vector.broadcast %51 : vector<1x32xf32> to vector<4x32xf32>
    %53 = arith.mulf %45, %52 : vector<4x32xf32>
    %54 = arith.addf %49, %53 : vector<4x32xf32>
    %55 = arith.truncf %54 : vector<4x32xf32> to vector<4x32xbf16>
    %56 = vector.broadcast %47 : vector<1x32xf32> to vector<4x32xf32>
    %57 = arith.mulf %42, %56 : vector<4x32xf32>
    %cst_29 = arith.constant 1.000000e+00 : f32
    %58 = vector.broadcast %cst_29 : f32 to vector<1x32xf32>
    %59 = arith.subf %58, %47 : vector<1x32xf32>
    %60 = vector.broadcast %59 : vector<1x32xf32> to vector<4x32xf32>
    %61 = arith.mulf %45, %60 : vector<4x32xf32>
    %62 = arith.addf %57, %61 : vector<4x32xf32>
    %63 = arith.truncf %62 : vector<4x32xf32> to vector<4x32xbf16>
    %c0_30 = arith.constant 0 : index
    %c0_31 = arith.constant 0 : index
    %64 = vector.load %arg9[%c0_30, %c0_31] : memref<32x64xbf16, #tpu.memory_space<vmem>>, vector<32x64xbf16>
    %cst_32 = arith.constant dense<0.000000e+00> : vector<4x64xf32>
    %65 = tpu.matmul %55, %64, %cst_32 {dimension_numbers = #tpu.dot_dimension_numbers<[1], [0], [0], [1], [0, 0, 1, 1], [], []>} : vector<4x32xbf16>, vector<32x64xbf16>, vector<4x64xf32> -> vector<4x64xf32>
    %cst_33 = arith.constant 0.000000e+00 : f32
    %66 = vector.broadcast %cst_33 : f32 to vector<4x64xf32>
    %67 = arith.maximumf %65, %66 : vector<4x64xf32>
    %68 = arith.mulf %67, %67 : vector<4x64xf32>
    %69 = arith.truncf %68 : vector<4x64xf32> to vector<4x64xbf16>
    %c0_34 = arith.constant 0 : index
    %c0_35 = arith.constant 0 : index
    %c0_36 = arith.constant 0 : index
    %70 = vector.load %arg12[%c0_34, %c0_35, %c0_36] : memref<1x4x64xbf16, #tpu.memory_space<vmem>>, vector<1x4x64xbf16>
    %71 = vector.shape_cast %70 : vector<1x4x64xbf16> to vector<4x64xbf16>
    %72 = vector.shape_cast %69 : vector<4x64xbf16> to vector<1x4x64xbf16>
    tpu.vector_store %arg12[%c0_34, %c0_35, %c0_36], %72 {strides = array<i32>} : memref<1x4x64xbf16, #tpu.memory_space<vmem>>, vector<1x4x64xbf16>,
    %c0_37 = arith.constant 0 : index
    %c0_38 = arith.constant 0 : index
    %73 = vector.load %arg10[%c0_37, %c0_38] : memref<32x32xbf16, #tpu.memory_space<vmem>>, vector<32x32xbf16>
    %cst_39 = arith.constant dense<0.000000e+00> : vector<4x32xf32>
    %74 = tpu.matmul %63, %73, %cst_39 {dimension_numbers = #tpu.dot_dimension_numbers<[1], [0], [0], [1], [0, 0, 1, 1], [], []>} : vector<4x32xbf16>, vector<32x32xbf16>, vector<4x32xf32> -> vector<4x32xf32>
    %75 = arith.truncf %74 : vector<4x32xf32> to vector<4x32xbf16>
    %c0_40 = arith.constant 0 : index
    %c0_41 = arith.constant 0 : index
    %c0_42 = arith.constant 0 : index
    %76 = vector.load %arg13[%c0_40, %c0_41, %c0_42] : memref<1x4x32xbf16, #tpu.memory_space<vmem>>, vector<1x4x32xbf16>
    %77 = vector.shape_cast %76 : vector<1x4x32xbf16> to vector<4x32xbf16>
    %78 = vector.shape_cast %75 : vector<4x32xbf16> to vector<1x4x32xbf16>
    tpu.vector_store %arg13[%c0_40, %c0_41, %c0_42], %78 {strides = array<i32>} : memref<1x4x32xbf16, #tpu.memory_space<vmem>>, vector<1x4x32xbf16>,
    return
  }
  func.func @transform_0(%arg0: i32) -> (i32, i32, i32) {
    %c0_i32 = arith.constant 0 : i32
    %c0_i32_0 = arith.constant 0 : i32
    %c0_i32_1 = arith.constant 0 : i32
    return %arg0, %c0_i32, %c0_i32_0 : i32, i32, i32
  }
  func.func @transform_1(%arg0: i32) -> (i32, i32, i32) {
    %c0_i32 = arith.constant 0 : i32
    %c0_i32_0 = arith.constant 0 : i32
    %c0_i32_1 = arith.constant 0 : i32
    return %arg0, %c0_i32, %c0_i32_0 : i32, i32, i32
  }
  func.func @transform_2(%arg0: i32) -> (i32, i32) {
    %c0_i32 = arith.constant 0 : i32
    %c0_i32_0 = arith.constant 0 : i32
    %c0_i32_1 = arith.constant 0 : i32
    return %c0_i32, %c0_i32_0 : i32, i32
  }
  func.func @transform_3(%arg0: i32) -> (i32, i32, i32) {
    %c0_i32 = arith.constant 0 : i32
    %c0_i32_0 = arith.constant 0 : i32
    %c0_i32_1 = arith.constant 0 : i32
    return %arg0, %c0_i32, %c0_i32_0 : i32, i32, i32
  }
  func.func @transform_4(%arg0: i32) -> (i32, i32) {
    %c0_i32 = arith.constant 0 : i32
    %c0_i32_0 = arith.constant 0 : i32
    %c0_i32_1 = arith.constant 0 : i32
    return %c0_i32, %c0_i32_0 : i32, i32
  }
  func.func @transform_5(%arg0: i32) -> (i32, i32) {
    %c0_i32 = arith.constant 0 : i32
    %c0_i32_0 = arith.constant 0 : i32
    %c0_i32_1 = arith.constant 0 : i32
    return %c0_i32, %c0_i32_0 : i32, i32
  }
  func.func @transform_6(%arg0: i32) -> (i32, i32) {
    %c0_i32 = arith.constant 0 : i32
    %c0_i32_0 = arith.constant 0 : i32
    %c0_i32_1 = arith.constant 0 : i32
    return %c0_i32, %c0_i32_0 : i32, i32
  }
  func.func @transform_7(%arg0: i32) -> (i32, i32) {
    %c0_i32 = arith.constant 0 : i32
    %c0_i32_0 = arith.constant 0 : i32
    %c0_i32_1 = arith.constant 0 : i32
    return %c0_i32, %c0_i32_0 : i32, i32
  }
  func.func @transform_8(%arg0: i32) -> (i32, i32) {
    %c0_i32 = arith.constant 0 : i32
    %c0_i32_0 = arith.constant 0 : i32
    %c0_i32_1 = arith.constant 0 : i32
    return %c0_i32, %c0_i32_0 : i32, i32
  }
  func.func @transform_9(%arg0: i32) -> (i32, i32) {
    %c0_i32 = arith.constant 0 : i32
    %c0_i32_0 = arith.constant 0 : i32
    %c0_i32_1 = arith.constant 0 : i32
    return %c0_i32, %c0_i32_0 : i32, i32
  }
  func.func @transform_10(%arg0: i32) -> (i32, i32, i32) {
    %c0_i32 = arith.constant 0 : i32
    %c0_i32_0 = arith.constant 0 : i32
    %c0_i32_1 = arith.constant 0 : i32
    return %arg0, %c0_i32, %c0_i32_0 : i32, i32, i32
  }
  func.func @transform_11(%arg0: i32) -> (i32, i32, i32) {
    %c0_i32 = arith.constant 0 : i32
    %c0_i32_0 = arith.constant 0 : i32
    %c0_i32_1 = arith.constant 0 : i32
    return %arg0, %c0_i32, %c0_i32_0 : i32, i32, i32
  }
  func.func @transform_12(%arg0: i32) -> (i32, i32, i32) {
    %c0_i32 = arith.constant 0 : i32
    %c0_i32_0 = arith.constant 0 : i32
    %c0_i32_1 = arith.constant 0 : i32
    return %arg0, %c0_i32, %c0_i32_0 : i32, i32, i32
  }
}

module attributes {stable_mosaic.version = 11 : i64} {
  func.func @_ln_kernel(%arg0: i32, %arg1: memref<8x32xf32, #tpu.memory_space<vmem>>, %arg2: memref<1x32xf32, #tpu.memory_space<vmem>>, %arg3: memref<1x32xf32, #tpu.memory_space<vmem>>, %arg4: memref<8x32xf32, #tpu.memory_space<vmem>>) attributes {dimension_semantics = [#tpu.dimension_semantics<parallel>], iteration_bounds = array<i64: 1>, scalar_prefetch = 0 : i64, scratch_operands = 0 : i64, tpu.core_type = #tpu.core_type<tc>, window_params = [{transform_indices = @transform_0, window_bounds = array<i64: 8, 32>}, {pipeline_mode = #tpu.pipeline_mode<synchronous>, transform_indices = @transform_1, window_bounds = array<i64: 1, 32>}, {pipeline_mode = #tpu.pipeline_mode<synchronous>, transform_indices = @transform_2, window_bounds = array<i64: 1, 32>}, {transform_indices = @transform_3, window_bounds = array<i64: 8, 32>}]} {
    %c0 = arith.constant 0 : index
    %c0_0 = arith.constant 0 : index
    %0 = vector.load %arg1[%c0, %c0_0] : memref<8x32xf32, #tpu.memory_space<vmem>>, vector<8x32xf32>
    %c0_1 = arith.constant 0 : index
    %c0_2 = arith.constant 0 : index
    %1 = vector.load %arg2[%c0_1, %c0_2] : memref<1x32xf32, #tpu.memory_space<vmem>>, vector<1x32xf32>
    %c0_3 = arith.constant 0 : index
    %c0_4 = arith.constant 0 : index
    %2 = vector.load %arg3[%c0_3, %c0_4] : memref<1x32xf32, #tpu.memory_space<vmem>>, vector<1x32xf32>
    %cst = arith.constant dense<0.000000e+00> : vector<8xf32>
    %3 = vector.multi_reduction <add>, %0, %cst [1] : vector<8x32xf32> to vector<8xf32>
    %4 = vector.shape_cast %3 : vector<8xf32> to vector<8x1xf32>
    %cst_5 = arith.constant 3.200000e+01 : f32
    %5 = vector.broadcast %cst_5 : f32 to vector<8x1xf32>
    %6 = arith.divf %4, %5 : vector<8x1xf32>
    %7 = vector.broadcast %6 : vector<8x1xf32> to vector<8x32xf32>
    %8 = arith.subf %0, %7 : vector<8x32xf32>
    %9 = arith.mulf %8, %8 : vector<8x32xf32>
    %cst_6 = arith.constant dense<0.000000e+00> : vector<8xf32>
    %10 = vector.multi_reduction <add>, %9, %cst_6 [1] : vector<8x32xf32> to vector<8xf32>
    %11 = vector.shape_cast %10 : vector<8xf32> to vector<8x1xf32>
    %cst_7 = arith.constant 3.200000e+01 : f32
    %12 = vector.broadcast %cst_7 : f32 to vector<8x1xf32>
    %13 = arith.divf %11, %12 : vector<8x1xf32>
    %cst_8 = arith.constant 9.99999997E-7 : f32
    %14 = vector.broadcast %cst_8 : f32 to vector<8x1xf32>
    %15 = arith.addf %13, %14 : vector<8x1xf32>
    %16 = math.rsqrt %15 : vector<8x1xf32>
    %17 = vector.broadcast %16 : vector<8x1xf32> to vector<8x32xf32>
    %18 = arith.mulf %8, %17 : vector<8x32xf32>
    %19 = vector.broadcast %1 : vector<1x32xf32> to vector<8x32xf32>
    %20 = arith.mulf %18, %19 : vector<8x32xf32>
    %21 = vector.broadcast %2 : vector<1x32xf32> to vector<8x32xf32>
    %22 = arith.addf %20, %21 : vector<8x32xf32>
    %c0_9 = arith.constant 0 : index
    %c0_10 = arith.constant 0 : index
    %23 = vector.load %arg4[%c0_9, %c0_10] : memref<8x32xf32, #tpu.memory_space<vmem>>, vector<8x32xf32>
    tpu.vector_store %arg4[%c0_9, %c0_10], %22 {strides = array<i32>} : memref<8x32xf32, #tpu.memory_space<vmem>>, vector<8x32xf32>,
    return
  }
  func.func @transform_0(%arg0: i32) -> (i32, i32) {
    %c0_i32 = arith.constant 0 : i32
    %c0_i32_0 = arith.constant 0 : i32
    return %arg0, %c0_i32 : i32, i32
  }
  func.func @transform_1(%arg0: i32) -> (i32, i32) {
    %c0_i32 = arith.constant 0 : i32
    %c0_i32_0 = arith.constant 0 : i32
    %c0_i32_1 = arith.constant 0 : i32
    return %c0_i32, %c0_i32_0 : i32, i32
  }
  func.func @transform_2(%arg0: i32) -> (i32, i32) {
    %c0_i32 = arith.constant 0 : i32
    %c0_i32_0 = arith.constant 0 : i32
    %c0_i32_1 = arith.constant 0 : i32
    return %c0_i32, %c0_i32_0 : i32, i32
  }
  func.func @transform_3(%arg0: i32) -> (i32, i32) {
    %c0_i32 = arith.constant 0 : i32
    %c0_i32_0 = arith.constant 0 : i32
    return %arg0, %c0_i32 : i32, i32
  }
}

module attributes {stable_mosaic.version = 11 : i64} {
  func.func @_cm_post_mlp_kernel(%arg0: i32, %arg1: memref<8x64xbf16, #tpu.memory_space<vmem>>, %arg2: memref<64x32xbf16, #tpu.memory_space<vmem>>, %arg3: memref<8x32xbf16, #tpu.memory_space<vmem>>, %arg4: memref<8x32xf32, #tpu.memory_space<vmem>>, %arg5: memref<1x32xf32, #tpu.memory_space<vmem>>, %arg6: memref<1x32xf32, #tpu.memory_space<vmem>>, %arg7: memref<32x64xbf16, #tpu.memory_space<vmem>>, %arg8: memref<1x64xf32, #tpu.memory_space<vmem>>, %arg9: memref<64x32xbf16, #tpu.memory_space<vmem>>, %arg10: memref<1x32xf32, #tpu.memory_space<vmem>>, %arg11: memref<8x32xf32, #tpu.memory_space<vmem>>) attributes {dimension_semantics = [#tpu.dimension_semantics<parallel>], iteration_bounds = array<i64: 1>, scalar_prefetch = 0 : i64, scratch_operands = 0 : i64, tpu.core_type = #tpu.core_type<tc>, window_params = [{transform_indices = @transform_0, window_bounds = array<i64: 8, 64>}, {pipeline_mode = #tpu.pipeline_mode<synchronous>, transform_indices = @transform_1, window_bounds = array<i64: 64, 32>}, {transform_indices = @transform_2, window_bounds = array<i64: 8, 32>}, {transform_indices = @transform_3, window_bounds = array<i64: 8, 32>}, {pipeline_mode = #tpu.pipeline_mode<synchronous>, transform_indices = @transform_4, window_bounds = array<i64: 1, 32>}, {pipeline_mode = #tpu.pipeline_mode<synchronous>, transform_indices = @transform_5, window_bounds = array<i64: 1, 32>}, {pipeline_mode = #tpu.pipeline_mode<synchronous>, transform_indices = @transform_6, window_bounds = array<i64: 32, 64>}, {pipeline_mode = #tpu.pipeline_mode<synchronous>, transform_indices = @transform_7, window_bounds = array<i64: 1, 64>}, {pipeline_mode = #tpu.pipeline_mode<synchronous>, transform_indices = @transform_8, window_bounds = array<i64: 64, 32>}, {pipeline_mode = #tpu.pipeline_mode<synchronous>, transform_indices = @transform_9, window_bounds = array<i64: 1, 32>}, {transform_indices = @transform_10, window_bounds = array<i64: 8, 32>}]} {
    %c0 = arith.constant 0 : index
    %c0_0 = arith.constant 0 : index
    %0 = vector.load %arg1[%c0, %c0_0] : memref<8x64xbf16, #tpu.memory_space<vmem>>, vector<8x64xbf16>
    %c0_1 = arith.constant 0 : index
    %c0_2 = arith.constant 0 : index
    %1 = vector.load %arg2[%c0_1, %c0_2] : memref<64x32xbf16, #tpu.memory_space<vmem>>, vector<64x32xbf16>
    %cst = arith.constant dense<0.000000e+00> : vector<8x32xf32>
    %2 = tpu.matmul %0, %1, %cst {dimension_numbers = #tpu.dot_dimension_numbers<[1], [0], [0], [1], [0, 0, 1, 1], [], []>} : vector<8x64xbf16>, vector<64x32xbf16>, vector<8x32xf32> -> vector<8x32xf32>
    %c0_3 = arith.constant 0 : index
    %c0_4 = arith.constant 0 : index
    %3 = vector.load %arg3[%c0_3, %c0_4] : memref<8x32xbf16, #tpu.memory_space<vmem>>, vector<8x32xbf16>
    %4 = arith.extf %3 : vector<8x32xbf16> to vector<8x32xf32>
    %5 = arith.negf %4 : vector<8x32xf32>
    %6 = math.exp %5 : vector<8x32xf32>
    %cst_5 = arith.constant 1.000000e+00 : f32
    %7 = vector.broadcast %cst_5 : f32 to vector<8x32xf32>
    %8 = arith.addf %7, %6 : vector<8x32xf32>
    %9 = arith.divf %7, %8 : vector<8x32xf32>
    %c0_6 = arith.constant 0 : index
    %c0_7 = arith.constant 0 : index
    %10 = vector.load %arg4[%c0_6, %c0_7] : memref<8x32xf32, #tpu.memory_space<vmem>>, vector<8x32xf32>
    %11 = arith.mulf %9, %2 : vector<8x32xf32>
    %12 = arith.addf %10, %11 : vector<8x32xf32>
    %c0_8 = arith.constant 0 : index
    %c0_9 = arith.constant 0 : index
    %13 = vector.load %arg5[%c0_8, %c0_9] : memref<1x32xf32, #tpu.memory_space<vmem>>, vector<1x32xf32>
    %c0_10 = arith.constant 0 : index
    %c0_11 = arith.constant 0 : index
    %14 = vector.load %arg6[%c0_10, %c0_11] : memref<1x32xf32, #tpu.memory_space<vmem>>, vector<1x32xf32>
    %cst_12 = arith.constant dense<0.000000e+00> : vector<8xf32>
    %15 = vector.multi_reduction <add>, %12, %cst_12 [1] : vector<8x32xf32> to vector<8xf32>
    %16 = vector.shape_cast %15 : vector<8xf32> to vector<8x1xf32>
    %cst_13 = arith.constant 3.200000e+01 : f32
    %17 = vector.broadcast %cst_13 : f32 to vector<8x1xf32>
    %18 = arith.divf %16, %17 : vector<8x1xf32>
    %19 = vector.broadcast %18 : vector<8x1xf32> to vector<8x32xf32>
    %20 = arith.subf %12, %19 : vector<8x32xf32>
    %21 = arith.mulf %20, %20 : vector<8x32xf32>
    %cst_14 = arith.constant dense<0.000000e+00> : vector<8xf32>
    %22 = vector.multi_reduction <add>, %21, %cst_14 [1] : vector<8x32xf32> to vector<8xf32>
    %23 = vector.shape_cast %22 : vector<8xf32> to vector<8x1xf32>
    %cst_15 = arith.constant 3.200000e+01 : f32
    %24 = vector.broadcast %cst_15 : f32 to vector<8x1xf32>
    %25 = arith.divf %23, %24 : vector<8x1xf32>
    %cst_16 = arith.constant 9.99999997E-7 : f32
    %26 = vector.broadcast %cst_16 : f32 to vector<8x1xf32>
    %27 = arith.addf %25, %26 : vector<8x1xf32>
    %28 = math.rsqrt %27 : vector<8x1xf32>
    %29 = vector.broadcast %28 : vector<8x1xf32> to vector<8x32xf32>
    %30 = arith.mulf %20, %29 : vector<8x32xf32>
    %31 = vector.broadcast %13 : vector<1x32xf32> to vector<8x32xf32>
    %32 = arith.mulf %30, %31 : vector<8x32xf32>
    %33 = vector.broadcast %14 : vector<1x32xf32> to vector<8x32xf32>
    %34 = arith.addf %32, %33 : vector<8x32xf32>
    %35 = arith.truncf %34 : vector<8x32xf32> to vector<8x32xbf16>
    %c0_17 = arith.constant 0 : index
    %c0_18 = arith.constant 0 : index
    %36 = vector.load %arg7[%c0_17, %c0_18] : memref<32x64xbf16, #tpu.memory_space<vmem>>, vector<32x64xbf16>
    %cst_19 = arith.constant dense<0.000000e+00> : vector<8x64xf32>
    %37 = tpu.matmul %35, %36, %cst_19 {dimension_numbers = #tpu.dot_dimension_numbers<[1], [0], [0], [1], [0, 0, 1, 1], [], []>} : vector<8x32xbf16>, vector<32x64xbf16>, vector<8x64xf32> -> vector<8x64xf32>
    %c0_20 = arith.constant 0 : index
    %c0_21 = arith.constant 0 : index
    %38 = vector.load %arg8[%c0_20, %c0_21] : memref<1x64xf32, #tpu.memory_space<vmem>>, vector<1x64xf32>
    %39 = vector.broadcast %38 : vector<1x64xf32> to vector<8x64xf32>
    %40 = arith.addf %37, %39 : vector<8x64xf32>
    %cst_22 = arith.constant 5.000000e-01 : f32
    %41 = vector.broadcast %cst_22 : f32 to vector<8x64xf32>
    %42 = arith.mulf %41, %40 : vector<8x64xf32>
    %cst_23 = arith.constant 0.707106769 : f32
    %43 = vector.broadcast %cst_23 : f32 to vector<8x64xf32>
    %44 = arith.mulf %40, %43 : vector<8x64xf32>
    %45 = math.erf %44 : vector<8x64xf32>
    %cst_24 = arith.constant 1.000000e+00 : f32
    %46 = vector.broadcast %cst_24 : f32 to vector<8x64xf32>
    %47 = arith.addf %46, %45 : vector<8x64xf32>
    %48 = arith.mulf %42, %47 : vector<8x64xf32>
    %49 = arith.truncf %48 : vector<8x64xf32> to vector<8x64xbf16>
    %c0_25 = arith.constant 0 : index
    %c0_26 = arith.constant 0 : index
    %50 = vector.load %arg9[%c0_25, %c0_26] : memref<64x32xbf16, #tpu.memory_space<vmem>>, vector<64x32xbf16>
    %cst_27 = arith.constant dense<0.000000e+00> : vector<8x32xf32>
    %51 = tpu.matmul %49, %50, %cst_27 {dimension_numbers = #tpu.dot_dimension_numbers<[1], [0], [0], [1], [0, 0, 1, 1], [], []>} : vector<8x64xbf16>, vector<64x32xbf16>, vector<8x32xf32> -> vector<8x32xf32>
    %52 = arith.addf %12, %51 : vector<8x32xf32>
    %c0_28 = arith.constant 0 : index
    %c0_29 = arith.constant 0 : index
    %53 = vector.load %arg10[%c0_28, %c0_29] : memref<1x32xf32, #tpu.memory_space<vmem>>, vector<1x32xf32>
    %54 = vector.broadcast %53 : vector<1x32xf32> to vector<8x32xf32>
    %55 = arith.addf %52, %54 : vector<8x32xf32>
    %c0_30 = arith.constant 0 : index
    %c0_31 = arith.constant 0 : index
    %56 = vector.load %arg11[%c0_30, %c0_31] : memref<8x32xf32, #tpu.memory_space<vmem>>, vector<8x32xf32>
    tpu.vector_store %arg11[%c0_30, %c0_31], %55 {strides = array<i32>} : memref<8x32xf32, #tpu.memory_space<vmem>>, vector<8x32xf32>,
    return
  }
  func.func @transform_0(%arg0: i32) -> (i32, i32) {
    %c0_i32 = arith.constant 0 : i32
    %c0_i32_0 = arith.constant 0 : i32
    return %arg0, %c0_i32 : i32, i32
  }
  func.func @transform_1(%arg0: i32) -> (i32, i32) {
    %c0_i32 = arith.constant 0 : i32
    %c0_i32_0 = arith.constant 0 : i32
    %c0_i32_1 = arith.constant 0 : i32
    return %c0_i32, %c0_i32_0 : i32, i32
  }
  func.func @transform_2(%arg0: i32) -> (i32, i32) {
    %c0_i32 = arith.constant 0 : i32
    %c0_i32_0 = arith.constant 0 : i32
    return %arg0, %c0_i32 : i32, i32
  }
  func.func @transform_3(%arg0: i32) -> (i32, i32) {
    %c0_i32 = arith.constant 0 : i32
    %c0_i32_0 = arith.constant 0 : i32
    return %arg0, %c0_i32 : i32, i32
  }
  func.func @transform_4(%arg0: i32) -> (i32, i32) {
    %c0_i32 = arith.constant 0 : i32
    %c0_i32_0 = arith.constant 0 : i32
    %c0_i32_1 = arith.constant 0 : i32
    return %c0_i32, %c0_i32_0 : i32, i32
  }
  func.func @transform_5(%arg0: i32) -> (i32, i32) {
    %c0_i32 = arith.constant 0 : i32
    %c0_i32_0 = arith.constant 0 : i32
    %c0_i32_1 = arith.constant 0 : i32
    return %c0_i32, %c0_i32_0 : i32, i32
  }
  func.func @transform_6(%arg0: i32) -> (i32, i32) {
    %c0_i32 = arith.constant 0 : i32
    %c0_i32_0 = arith.constant 0 : i32
    %c0_i32_1 = arith.constant 0 : i32
    return %c0_i32, %c0_i32_0 : i32, i32
  }
  func.func @transform_7(%arg0: i32) -> (i32, i32) {
    %c0_i32 = arith.constant 0 : i32
    %c0_i32_0 = arith.constant 0 : i32
    %c0_i32_1 = arith.constant 0 : i32
    return %c0_i32, %c0_i32_0 : i32, i32
  }
  func.func @transform_8(%arg0: i32) -> (i32, i32) {
    %c0_i32 = arith.constant 0 : i32
    %c0_i32_0 = arith.constant 0 : i32
    %c0_i32_1 = arith.constant 0 : i32
    return %c0_i32, %c0_i32_0 : i32, i32
  }
  func.func @transform_9(%arg0: i32) -> (i32, i32) {
    %c0_i32 = arith.constant 0 : i32
    %c0_i32_0 = arith.constant 0 : i32
    %c0_i32_1 = arith.constant 0 : i32
    return %c0_i32, %c0_i32_0 : i32, i32
  }
  func.func @transform_10(%arg0: i32) -> (i32, i32) {
    %c0_i32 = arith.constant 0 : i32
    %c0_i32_0 = arith.constant 0 : i32
    return %arg0, %c0_i32 : i32, i32
  }
}

</mosaic_0001>

<bundles_post_ra>
// kernel: vision_rwkv_forward.12
= control target key start
LH: loop header
LB: loop body
LE: loop exit
PB: predicated region body
PF: predicated region fallthrough
CT: control target
= control target key end

     0   :  { %vm21_vm0 = vcmask 254976   ;;  %v249_v0 = vmov -1e+38   ;;  %v250_v1 = vmov 0.0   ;;  %vm56_vm1 = vcmask 253952   ;;  %s336_s1 = inlined_call_operand.vmem [shape: f32[1,32], index: 1, kind: input, shape index: {}]   ;;  %s337_s2 = inlined_call_operand.vmem [shape: bf16[4,2,32], index: 2, kind: input, shape index: {}]   ;;  %s338_s0 = inlined_call_operand.vmem [shape: f32[1,32], index: 0, kind: input, shape index: {}]   ;;  %s339_s3 = inlined_call_operand.vmem [shape: bf16[4,2,32], index: 3, kind: input, shape index: {}]   ;;  %s340_s4 = inlined_call_operand.vmem [shape: bf16[4,2,32], index: 4, kind: output, shape index: {}]  }
   0x1   :  { %24 = vst.msk [vmem:[#allocation4] sm:$0x3] %vm21_vm0, %v249_v0  ;;  %22 = vst.msk [vmem:[#allocation2] sm:$0x3] %vm21_vm0, %v250_v1  ;;  %v30_v2 = vld [vmem:[%s337_s2] sm:$0x1] }
   0x2   :  { %23 = vst.msk [vmem:[#allocation3] sm:$0x3] %vm21_vm0, %v250_v1  ;;  %v196_v3 = vld [vmem:[%s336_s1] ss:$0 sm:$0xff]  ;;  %v31_v4 = vunpack.c.l.bf16 %v30_v2  ;;  %v198_v5 = vld [vmem:[%s337_s2 + $0x1] sm:$0x1] }
   0x3   :  { %v197_v7 = vld [vmem:[%s338_s0] ss:$0 sm:$0xff]  ;;  %v79_v8 = vunpack.c.l.bf16 %v198_v5  ;;  %v201_v10 = vld [vmem:[%s337_s2 + $0x2] sm:$0x1]  ;;  %v204_v18 = vld [vmem:[%s337_s2 + $0x3] sm:$0x1] }
   0x4   :  { %v40_v6 = vadd.f32 %v196_v3, %v31_v4  ;;  %v116_v17 = vunpack.c.l.bf16 %v201_v10  ;;  %v297_v25 = vunpack.c.l.bf16 %v204_v18  ;;  %v303_v50 = vld [vmem:[%s339_s3] sm:$0x1]  ;;  %v199_v10 = vld [vmem:[%s339_s3 + $0x1] sm:$0x1] }
   0x5   :  { %v83_v13 = vadd.f32 %v196_v3, %v79_v8  ;;  %v33_v60 = vunpack.c.l.bf16 %v303_v50 }
   0x6   :  { %v120_v28 = vadd.f32 %v196_v3, %v116_v17  ;;  %v157_v39 = vadd.f32 %v196_v3, %v297_v25 }
   0x8   :  { %v29_v9 = vld [vmem:[#allocation4] sm:$0x3]  ;;  %v27_v3 = vld [vmem:[#allocation2] sm:$0x3] }
   0x9   :  { %v41_v11 = vmax.f32 %v29_v9, %v40_v6  ;;  %v64_v12 = vadd.f32 %v197_v7, %v29_v9  ;;  %v28_v51 = vld [vmem:[#allocation3] sm:$0x3] }
   0xb   :  { %v42_v14 = vsub.f32 %v29_v9, %v41_v11  ;;  %v45_v15 = vsub.f32 %v40_v6, %v41_v11  ;;  %v65_v16 = vmax.f32 %v64_v12, %v31_v4 }
   0xd   :  { %v43_v19 = vmul.f32 1.442695, %v42_v14  ;;  %v46_v20 = vmul.f32 1.442695, %v45_v15  ;;  %v66_v21 = vsub.f32 %v64_v12, %v65_v16  ;;  %v69_v22 = vsub.f32 %v31_v4, %v65_v16 }
   0xe   :  { %v84_v23 = vmax.f32 %v65_v16, %v83_v13  ;;  %v101_v24 = vadd.f32 %v197_v7, %v65_v16 }
   0xf   :  { %209 = vpow2.f32 %v43_v19  ;;  %v67_v26 = vmul.f32 1.442695, %v66_v21  ;;  %v70_v27 = vmul.f32 1.442695, %v69_v22 }
  0x10   :  { %211 = vpow2.f32 %v46_v20  ;;  %v85_v29 = vsub.f32 %v65_v16, %v84_v23  ;;  %v88_v30 = vsub.f32 %v83_v13, %v84_v23  ;;  %v102_v31 = vmax.f32 %v101_v24, %v79_v8  ;;  %v202_v23 = vld [vmem:[%s339_s3 + $0x2] sm:$0x1] }
  0x11   :  { %213 = vpow2.f32 %v67_v26  ;;  %v82_v16 = vunpack.c.l.bf16 %v199_v10 }
  0x12   :  { %215 = vpow2.f32 %v70_v27  ;;  %v89_v32 = vmul.f32 1.442695, %v88_v30  ;;  %v103_v33 = vsub.f32 %v101_v24, %v102_v31  ;;  %v106_v34 = vsub.f32 %v79_v8, %v102_v31 }
  0x13   :  { %v121_v35 = vmax.f32 %v102_v31, %v120_v28  ;;  %v138_v36 = vadd.f32 %v197_v7, %v102_v31  ;;  %v86_v37 = vmul.f32 1.442695, %v85_v29  ;;  %v119_v29 = vunpack.c.l.bf16 %v202_v23 }
  0x14   :  { %217 = vpow2.f32 %v89_v32  ;;  %v104_v38 = vmul.f32 1.442695, %v103_v33  ;;  %v107_v40 = vmul.f32 1.442695, %v106_v34 }
  0x15   :  { %v122_v41 = vsub.f32 %v102_v31, %v121_v35  ;;  %v125_v42 = vsub.f32 %v120_v28, %v121_v35  ;;  %v139_v43 = vmax.f32 %v138_v36, %v116_v17  ;;  %219 = vpow2.f32 %v86_v37  ;;  %v205_v35 = vld [vmem:[%s339_s3 + $0x3] sm:$0x1] }
  0x16   :  { %221 = vpow2.f32 %v104_v38 }
  0x17   :  { %v123_v44 = vmul.f32 1.442695, %v122_v41  ;;  %v126_v45 = vmul.f32 1.442695, %v125_v42  ;;  %v140_v46 = vsub.f32 %v138_v36, %v139_v43  ;;  %v143_v47 = vsub.f32 %v116_v17, %v139_v43 }
  0x18   :  { %v158_v48 = vmax.f32 %v139_v43, %v157_v39  ;;  %v175_v49 = vadd.f32 %v197_v7, %v139_v43  ;;  %223 = vpow2.f32 %v107_v40 }
  0x19   :  { %v210_v52 = vpop.eup %209  ;;  %225 = vpow2.f32 %v123_v44  ;;  %v141_v53 = vmul.f32 1.442695, %v140_v46  ;;  %v144_v54 = vmul.f32 1.442695, %v143_v47  ;;  %v156_v44 = vunpack.c.l.bf16 %v205_v35 }
  0x1a   :  { %v212_v55 = vpop.eup %211  ;;  %227 = vpow2.f32 %v126_v45  ;;  %v159_v56 = vsub.f32 %v139_v43, %v158_v48  ;;  %v162_v57 = vsub.f32 %v157_v39, %v158_v48  ;;  %v176_v58 = vmax.f32 %v175_v49, %v297_v25 }
  0x1b   :  { %v214_v59 = vpop.eup %213  ;;  %229 = vpow2.f32 %v141_v53  ;;  %v51_v61 = vmul.f32 %v210_v52, %v28_v51  ;;  %v48_v33 = vmul.f32 %v210_v52, %v27_v3  ;;  %v49_v36 = vmul.f32 %v212_v55, %v33_v60 }
  0x1c   :  { %v216_v62 = vpop.eup %215  ;;  %v160_v63 = vmul.f32 1.442695, %v159_v56  ;;  %v163_v0 = vmul.f32 1.442695, %v162_v57  ;;  %v177_v1 = vsub.f32 %v175_v49, %v176_v58  ;;  %v180_v2 = vsub.f32 %v297_v25, %v176_v58  ;;  %191 = vst.msk [vmem:[#allocation4] sm:$0x3] %vm21_vm0, %v176_v58 }
  0x1d   :  { %v72_v4 = vmul.f32 %v214_v59, %v27_v3  ;;  %v73_v5 = vmul.f32 %v216_v62, %v33_v60  ;;  %231 = vpow2.f32 %v144_v54  ;;  %v52_v6 = vadd.f32 %v212_v55, %v51_v61 }
  0x1e   :  { %v218_v7 = vpop.eup %217  ;;  %233 = vpow2.f32 %v160_v63  ;;  %v178_v8 = vmul.f32 1.442695, %v177_v1  ;;  %v181_v9 = vmul.f32 1.442695, %v180_v2  ;;  %v75_v11 = vmul.f32 %v214_v59, %v28_v51 }
  0x1f   :  { %v220_v12 = vpop.eup %219  ;;  %235 = vpow2.f32 %v163_v0  ;;  %v74_v13 = vadd.f32 %v73_v5, %v72_v4  ;;  %v50_v48 = vadd.f32 %v49_v36, %v48_v33  ;;  %v92_v56 = vmul.f32 %v218_v7, %v82_v16 }
  0x20   :  { %v222_v14 = vpop.eup %221  ;;  %237 = vpow2.f32 %v178_v8  ;;  %v76_v15 = vadd.f32 %v216_v62, %v75_v11 }
  0x21   :  { %239 = vpow2.f32 %v181_v9  ;;  %v109_v17 = vmul.f32 %v222_v14, %v74_v13  ;;  %v91_v49 = vmul.f32 %v220_v12, %v74_v13 }
  0x22   :  { %v224_v18 = vpop.eup %223  ;;  %241 = vrcp.f32 %v52_v6  ;;  %v94_v19 = vmul.f32 %v220_v12, %v76_v15  ;;  %v112_v20 = vmul.f32 %v222_v14, %v76_v15 }
  0x23   :  { %v226_v21 = vpop.eup %225  ;;  %v110_v22 = vmul.f32 %v224_v18, %v82_v16  ;;  %v93_v59 = vadd.f32 %v92_v56, %v91_v49 }
  0x24   :  { %v228_v24 = vpop.eup %227  ;;  %v95_v25 = vadd.f32 %v218_v7, %v94_v19  ;;  %v113_v26 = vadd.f32 %v224_v18, %v112_v20 }
  0x25   :  { %v230_v27 = vpop.eup %229  ;;  %v111_v28 = vadd.f32 %v110_v22, %v109_v17  ;;  %v129_v63 = vmul.f32 %v228_v24, %v119_v29 }
  0x26   :  { %243 = vrcp.f32 %v95_v25  ;;  %v131_v30 = vmul.f32 %v226_v21, %v113_v26  ;;  %v149_v31 = vmul.f32 %v230_v27, %v113_v26 }
  0x27   :  { %v232_v32 = vpop.eup %231  ;;  %v146_v34 = vmul.f32 %v230_v27, %v111_v28  ;;  %v128_v60 = vmul.f32 %v226_v21, %v111_v28 }
  0x28   :  { %v234_v37 = vpop.eup %233  ;;  %v147_v38 = vmul.f32 %v232_v32, %v119_v29  ;;  %v132_v39 = vadd.f32 %v228_v24, %v131_v30  ;;  %v150_v40 = vadd.f32 %v232_v32, %v149_v31 }
  0x29   :  { %v236_v41 = vpop.eup %235  ;;  %v130_v1 = vadd.f32 %v129_v63, %v128_v60 }
  0x2a   :  { %v238_v42 = vpop.eup %237  ;;  %v148_v43 = vadd.f32 %v147_v38, %v146_v34  ;;  %v168_v45 = vmul.f32 %v234_v37, %v150_v40  ;;  %245 = vrcp.f32 %v132_v39  ;;  %v166_v5 = vmul.f32 %v236_v41, %v156_v44 }
  0x2b   :  { %v240_v46 = vpop.eup %239  ;;  %v186_v47 = vmul.f32 %v238_v42, %v150_v40 }
  0x2c   :  { %v242_v50 = vpop.eup %241  ;;  %v183_v51 = vmul.f32 %v238_v42, %v148_v43  ;;  %v184_v52 = vmul.f32 %v240_v46, %v156_v44  ;;  %v169_v53 = vadd.f32 %v236_v41, %v168_v45  ;;  %v165_v2 = vmul.f32 %v234_v37, %v148_v43 }
  0x2d   :  { %v187_v54 = vadd.f32 %v240_v46, %v186_v47  ;;  %v54_v55 = vmul.f32 %v242_v50, %v50_v48 }
  0x2e   :  { %v185_v57 = vadd.f32 %v184_v52, %v183_v51  ;;  %247 = vrcp.f32 %v169_v53  ;;  %v167_v7 = vadd.f32 %v166_v5, %v165_v2 }
  0x2f   :  { %190 = vst.msk [vmem:[#allocation3] sm:$0x3] %vm21_vm0, %v187_v54  ;;  %v55_v58 = vpack.c.bf16 %v54_v55, %v54_v55 }
  0x30   :  { %v244_v61 = vpop.eup %243  ;;  %189 = vst.msk [vmem:[#allocation2] sm:$0x3] %vm21_vm0, %v185_v57 }
  0x31   :  { %57 = vst.msk [vmem:[%s340_s4] sm:$0x1] %vm56_vm1, %v55_v58  ;;  %v97_v62 = vmul.f32 %v244_v61, %v93_v59 }
  0x33   :  { %v98_v0 = vpack.c.bf16 %v97_v62, %v97_v62 }
  0x34   :  { %v246_v3 = vpop.eup %245 }
  0x35   :  { %200 = vst.msk [vmem:[%s340_s4 + $0x1] sm:$0x1] %vm56_vm1, %v98_v0  ;;  %v134_v4 = vmul.f32 %v246_v3, %v130_v1 }
  0x37   :  { %v135_v6 = vpack.c.bf16 %v134_v4, %v134_v4 }
  0x38   :  { %v248_v8 = vpop.eup %247 }
  0x39   :  { %203 = vst.msk [vmem:[%s340_s4 + $0x2] sm:$0x1] %vm56_vm1, %v135_v6  ;;  %v171_v9 = vmul.f32 %v248_v8, %v167_v7 }
  0x3b   :  { %v172_v10 = vpack.c.bf16 %v171_v9, %v171_v9 }
  0x3d   :  { %206 = vst.msk [vmem:[%s340_s4 + $0x3] sm:$0x1] %vm56_vm1, %v172_v10 }

// kernel: vision_rwkv_forward.10
= control target key start
LH: loop header
LB: loop body
LE: loop exit
PB: predicated region body
PF: predicated region fallthrough
CT: control target
= control target key end

     0   :  { %s591_s21 = smov 0   ;;  %s666_s0 = inlined_call_operand.vmem [shape: bf16[2,4,192], index: 0, kind: input, shape index: {}]   ;;  %s667_s1 = inlined_call_operand.vmem [shape: bf16[192,32], index: 1, kind: input, shape index: {}]   ;;  %s668_s2 = inlined_call_operand.vmem [shape: f32[1,32], index: 2, kind: input, shape index: {}]   ;;  %s669_s3 = inlined_call_operand.vmem [shape: f32[4,32], index: 3, kind: input, shape index: {}]   ;;  %s670_s4 = inlined_call_operand.vmem [shape: f32[1,32], index: 4, kind: input, shape index: {}]   ;;  %s671_s5 = inlined_call_operand.vmem [shape: f32[1,32], index: 5, kind: input, shape index: {}]   ;;  %s672_s6 = inlined_call_operand.vmem [shape: f32[2,4,32], index: 6, kind: output, shape index: {}]  }
   0x1 LB: > { %s496_s22 = sadd.s32 4294967295, %s553_s21   ;;  %p500_p0 = scmp.ge.s32.totalorder %s553_s21, 1  ;;  %s553_s21 = sphi %s591_s21, %s16_s21  }
   0x2   : > { %p212_p1 = scmp.lt.s32.totalorder %s553_s21, 3 }
   0x4   : > { %p213_p2 = pnand %p500_p0, %p212_p1 }
   0x5   : > { %v533_v0 = vld [vmem:[%s667_s1] sm:$0xff] (!%p213_p2)   ;;  %v555_v1 = vmov (!%p213_p2), 0   ;;  %p241_p3 = scmp.lt.s32.totalorder (!%p213_p2), %s496_s22, 1  ;;  %v534_v2 = vld [vmem:[%s667_s1 + $0x8] sm:$0xff] (!%p213_p2)   ;;  %v535_v3 = vld [vmem:[%s667_s1 + $0x10] sm:$0xff] (!%p213_p2)   ;;  %vm365_vm0 = vcmask (!%p213_p2), 523264  }
   0x6   : > { %216 = sbr.rel (%p213_p2) target bundleno = 584 (0x248), region = 44  ;;  %369 = vmatprep.subr.bf16.mxu0 (!%p213_p2), %v555_v1  ;;  %v536_v4 = vld [vmem:[%s667_s1 + $0x18] sm:$0xff] (!%p213_p2)   ;;  %v537_v7 = vld [vmem:[%s667_s1 + $0x20] sm:$0xff] (!%p213_p2)   ;;  %v538_v8 = vld [vmem:[%s667_s1 + $0x28] sm:$0xff] (!%p213_p2)   ;;  %vm413_vm1 = vcmask (!%p213_p2), 257024  }
   0x7   : > { %370 = vmatpush1.bf16.msra.mxu0 (!%p213_p2), %v533_v0  ;;  %v539_v9 = vld [vmem:[%s667_s1 + $0x30] sm:$0xff] (!%p213_p2)   ;;  %v540_v10 = vld [vmem:[%s667_s1 + $0x38] sm:$0xff] (!%p213_p2)   ;;  %v541_v11 = vld [vmem:[%s667_s1 + $0x40] sm:$0xff] (!%p213_p2)  }
   0x8   : > { %371 = vmatprep.subr.bf16.mxu0 (!%p213_p2), %v555_v1  ;;  %v542_v12 = vld [vmem:[%s667_s1 + $0x48] sm:$0xff] (!%p213_p2)   ;;  %v543_v13 = vld [vmem:[%s667_s1 + $0x50] sm:$0xff] (!%p213_p2)   ;;  %v544_v14 = vld [vmem:[%s667_s1 + $0x58] sm:$0xff] (!%p213_p2)  }
   0x9   : > { %v504_v15 = vld [vmem:[%s668_s2] ss:$0 sm:$0xff] (!%p213_p2) }
   0xa   : > { %v409_v17 = vld [vmem:[%s669_s3] sm:$0xf] (!%p213_p2) }
   0xb   : > { %372 = vmatpush1.bf16.msra.mxu0 (!%p213_p2), %v534_v2  ;;  %v519_v33 = vld [vmem:[%s670_s4] ss:$0 sm:$0xff] (!%p213_p2) }
   0xc   : > { %373 = vmatprep.subr.bf16.mxu0 (!%p213_p2), %v555_v1  ;;  %v520_v35 = vld [vmem:[%s671_s5] ss:$0 sm:$0xff] (!%p213_p2) }
   0xd   : > { %s674_s22 = smov (!%p241_p3, %s496_s22), 1 }
   0xe   : > { %s523_s29 = sshll.u32 %s674_s22, 2 }
   0xf   : > { %s245_s8 = scalar_lea.vmem %s666_s0, %s523_s29  ;;  %374 = vmatpush1.bf16.msra.mxu0 %v535_v3  ;;  %s249_s16 = scalar_lea.vmem %s672_s6, %s523_s29 }
  0x10   : > { %375 = vmatprep.subr.bf16.mxu0 %v555_v1  ;;  %v505_v5 = vld.sshfl [vmem:[%s245_s8] sm:$0x33 pattern:$0x76325410] }
  0x11   : > { %v291_v6 = vcombine.high %v505_v5, %v505_v5 }
  0x13   : > { %376 = vmatpush1.bf16.msra.mxu0 %v536_v4  ;;  %518 = vmatprep.mubr.msk.bf16.mxu0 %vm365_vm0, %v291_v6 }
  0x14   : > { %377 = vmatprep.subr.bf16.mxu0 %v555_v1 }
  0x17   : > { %378 = vmatpush1.bf16.msra.mxu0 %v537_v7 }
  0x18   : > { %379 = vmatprep.subr.bf16.mxu0 %v555_v1 }
  0x1b   : > { %380 = vmatpush1.bf16.msra.mxu0 %v538_v8 }
  0x1c   : > { %381 = vmatprep.subr.bf16.mxu0 %v555_v1 }
  0x1f   : > { %382 = vmatpush1.bf16.msra.mxu0 %v539_v9 }
  0x20   : > { %383 = vmatprep.subr.bf16.mxu0 %v555_v1 }
  0x23   : > { %384 = vmatpush1.bf16.msra.mxu0 %v540_v10 }
  0x24   : > { %385 = vmatprep.subr.bf16.mxu0 %v555_v1 }
  0x27   : > { %386 = vmatpush1.bf16.msra.mxu0 %v541_v11 }
  0x28   : > { %387 = vmatprep.subr.bf16.mxu0 %v555_v1 }
  0x2b   : > { %388 = vmatpush1.bf16.msra.mxu0 %v542_v12 }
  0x2c   : > { %389 = vmatprep.subr.bf16.mxu0 %v555_v1 }
  0x2f   : > { %390 = vmatpush1.bf16.msra.mxu0 %v543_v13 }
  0x30   : > { %391 = vmatprep.subr.bf16.mxu0 %v555_v1 }
  0x33   : > { %392 = vmatpush1.bf16.msra.mxu0 %v544_v14 }
  0x36   : > { %402 = vmatmul.mubr.bf16.vlgmr.msra.gmra.mrb[0].mxu0 %v505_v5 }
 0x109   : > { %v403_v16 = vpop.f32.mrb[0].mxu0 }
 0x10a   : > { %v404_v18 = vadd.f32 %v504_v15, %v403_v16  ;;  %v405_v19 = vpop.f32.mrb[1].mxu0 }
 0x10b   : > { %v406_v20 = vpop.f32.mrb[2].mxu0 }
 0x10c   : > { %v407_v21 = vpop.f32.mrb[3].mxu0  ;;  %v410_v22 = vadd.f32 %v409_v17, %v404_v18 }
 0x10e   : > { %v414_v23 = vsel %vm413_vm1, %v410_v22, 0.0 }
 0x10f   : > { %415 = vadd.xlane.f32.xlu0 %v414_v23 }
 0x19c   : > { %v416_v24 = vpop.xlane.xlu0 %415 }
 0x19d   : > { %v418_v25 = vmul.f32 0.03125, %v416_v24 }
 0x19f   : > { %v419_v26 = vsub.f32 %v410_v22, %v418_v25 }
 0x1a1   : > { %v420_v27 = vmul.f32 %v419_v26, %v419_v26 }
 0x1a3   : > { %v421_v28 = vsel %vm413_vm1, %v420_v27, 0.0 }
 0x1a4   : > { %422 = vadd.xlane.f32.xlu0 %v421_v28 }
 0x231   : > { %v423_v29 = vpop.xlane.xlu0 %422 }
 0x232   : > { %v424_v30 = vmul.f32 0.03125, %v423_v29 }
 0x234   : > { %v425_v31 = vadd.f32 1e-05, %v424_v30 }
 0x236   : > { %545 = vrsqrt.f32 %v425_v31 }
 0x240   : > { %v546_v32 = vpop.eup %545 }
 0x241   : > { %v427_v34 = vmul.f32 %v546_v32, %v419_v26 }
 0x243   : > { %v434_v36 = vmul.f32 %v519_v33, %v427_v34 }
 0x245   : > { %v441_v37 = vadd.f32 %v520_v35, %v434_v36 }
 0x247   : > { %442 = vst.msk [vmem:[%s249_s16] sm:$0xf] %vm413_vm1, %v441_v37 }
 0x248 PF: > { %s16_s21 = sadd.s32 1, %s553_s21  }
 0x249   : > { %p13_p4 = scmp.ge.s32.totalorder %s16_s21, 4  }
 0x24b   :  { %15 = sbr.rel (!%p13_p4) target bundleno = 1 (0x1), region = 74 }

// kernel: vision_rwkv_forward.11
= control target key start
LH: loop header
LB: loop body
LE: loop exit
PB: predicated region body
PF: predicated region fallthrough
CT: control target
= control target key end

     0   :  { %s938_s17 = smov 0   ;;  %s1004_s0 = inlined_call_operand.vmem [shape: f32[2,4,32], index: 0, kind: input, shape index: {}]   ;;  %s1005_s1 = inlined_call_operand.vmem [shape: f32[1,32], index: 1, kind: input, shape index: {}]   ;;  %s1006_s2 = inlined_call_operand.vmem [shape: f32[1,32], index: 2, kind: input, shape index: {}]   ;;  %s1007_s3 = inlined_call_operand.vmem [shape: f32[1,32], index: 3, kind: input, shape index: {}]   ;;  %s1008_s4 = inlined_call_operand.vmem [shape: f32[1,32], index: 4, kind: input, shape index: {}]   ;;  %s1009_s5 = inlined_call_operand.vmem [shape: f32[1,32], index: 5, kind: input, shape index: {}]   ;;  %s1010_s6 = inlined_call_operand.vmem [shape: bf16[32,32], index: 6, kind: input, shape index: {}]   ;;  %s1011_s7 = inlined_call_operand.vmem [shape: bf16[32,32], index: 7, kind: input, shape index: {}]   ;;  %s1012_s8 = inlined_call_operand.vmem [shape: bf16[32,32], index: 8, kind: input, shape index: {}]   ;;  %s1013_s9 = inlined_call_operand.vmem [shape: bf16[2,4,32], index: 9, kind: output, shape index: {0}]   ;;  %s1014_s10 = inlined_call_operand.vmem [shape: bf16[2,4,32], index: 10, kind: output, shape index: {1}]   ;;  %s1015_s11 = inlined_call_operand.vmem [shape: bf16[2,4,32], index: 11, kind: output, shape index: {2}]  }
   0x1 LB: > { %s795_s18 = sadd.s32 4294967295, %s874_s17   ;;  %p799_p0 = scmp.ge.s32.totalorder %s874_s17, 1  ;;  %s874_s17 = sphi %s938_s17, %s22_s17  }
   0x2   : > { %p341_p1 = scmp.lt.s32.totalorder %s874_s17, 3 }
   0x4   : > { %p342_p2 = pnand %p799_p0, %p341_p1 }
   0x5   : > { %p387_p3 = scmp.lt.s32.totalorder (!%p342_p2), %s795_s18, 1  ;;  %vm407_vm0 = vcmask (!%p342_p2), 257024   ;;  %v860_v7 = vld [vmem:[%s1010_s6] sm:$0xff] (!%p342_p2)   ;;  %v876_v9 = vmov (!%p342_p2), 0.0   ;;  %v862_v10 = vld [vmem:[%s1010_s6 + $0x8] sm:$0xff] (!%p342_p2)   ;;  %vm877_vm1 = vmmov (!%p342_p2), 0   ;;  %v445_v15 = vlaneseq (!%p342_p2) }
   0x6   : > { %345 = sbr.rel (%p342_p2) target bundleno = 562 (0x232), region = 56  ;;  %v861_v8 = vld [vmem:[%s1011_s7] sm:$0xff] (!%p342_p2)   ;;  %826 = vmatprep.subr.bf16.mxu0 (!%p342_p2), %v876_v9  ;;  %834 = vmatprep.subr.bf16.mxu1 (!%p342_p2), %v876_v9  ;;  %v863_v11 = vld [vmem:[%s1011_s7 + $0x8] sm:$0xff] (!%p342_p2)   ;;  %vm439_vm2 = vcmask (!%p342_p2), 1040384   ;;  %vm511_vm3 = vcmask (!%p342_p2), 261120   ;;  %vm556_vm4 = vcmask (!%p342_p2), 254976  }
   0x7   : > { %827 = vmatpush3.bf16.msra.mxu0 (!%p342_p2), %v860_v7  ;;  %835 = vmatpush3.bf16.msra.mxu1 (!%p342_p2), %v861_v8  ;;  %v446_v16 = vshrl.u32 (!%p342_p2), %v445_v15, 7  ;;  %v441_v17 = vld [vmem:[%s1007_s3] sm:$0x1] (!%p342_p2)  ;;  %v865_v49 = vld [vmem:[%s1012_s8 + $0x8] sm:$0xff] (!%p342_p2)  }
   0x8   : > { %828 = vmatprep.subr.bf16.mxu0 (!%p342_p2), %v876_v9  ;;  %836 = vmatprep.subr.bf16.mxu1 (!%p342_p2), %v876_v9  ;;  %v442_v18 = vld [vmem:[%s1008_s4] sm:$0x1] (!%p342_p2)  ;;  %v451_v24 = vsub.f32 (!%p342_p2), 1.0, %v441_v17 }
   0x9   : > { %830 = vmatprep.mubr.msk.bf16.mxu0 (!%p342_p2), %vm877_vm1, %v876_v9  ;;  %838 = vmatprep.mubr.msk.bf16.mxu1 (!%p342_p2), %vm877_vm1, %v876_v9  ;;  %v804_v20 = vld [vmem:[%s1005_s1] ss:$0 sm:$0xff] (!%p342_p2)  ;;  %v447_v22 = vsub.s32 (!%p342_p2), 0, %v446_v16  ;;  %v468_v25 = vsub.f32 (!%p342_p2), 1.0, %v442_v18 }
   0xa   : > { %v805_v23 = vld [vmem:[%s1006_s2] ss:$0 sm:$0xff] (!%p342_p2) }
   0xb   : > { %829 = vmatpush3.bf16.msra.mxu0 (!%p342_p2), %v862_v10  ;;  %837 = vmatpush3.bf16.msra.mxu1 (!%p342_p2), %v863_v11  ;;  %v443_v26 = vld [vmem:[%s1009_s5] sm:$0x1] (!%p342_p2)  ;;  %v448_v29 = vrot.slane (!%p342_p2), %v441_v17, %v447_v22  ;;  %v456_v31 = vrot.slane (!%p342_p2), %v451_v24, %v447_v22  ;;  %v465_v32 = vrot.slane (!%p342_p2), %v442_v18, %v447_v22 }
   0xc   : > { %842 = vmatprep.subr.bf16.mxu0 (!%p342_p2), %v876_v9  ;;  %v485_v30 = vsub.f32 (!%p342_p2), 1.0, %v443_v26  ;;  %v473_v33 = vrot.slane (!%p342_p2), %v468_v25, %v447_v22  ;;  %v482_v43 = vrot.slane (!%p342_p2), %v443_v26, %v447_v22  ;;  %v864_v44 = vld [vmem:[%s1012_s8] sm:$0xff] (!%p342_p2)  }
   0xd   : > { %s1017_s18 = smov (!%p387_p3, %s795_s18), 1 }
   0xe   : > { %s800_s19 = sshll.u32 %s1017_s18, 2  ;;  %v490_v36 = vrot.slane %v485_v30, %v447_v22  ;;  %s801_s28 = sshll.u32 %s1017_s18, 1 }
   0xf   : > { %s390_s22 = scalar_lea.vmem %s1004_s0, %s800_s19  ;;  %s394_s12 = scalar_lea.vmem %s1013_s9, %s801_s28 }
  0x10   : > { %v404_v0 = vld [vmem:[%s390_s22] sm:$0xf]  ;;  %s398_s15 = scalar_lea.vmem %s1014_s10, %s801_s28  ;;  %s402_s19 = scalar_lea.vmem %s1015_s11, %s801_s28 }
  0x11   : > { %v408_v1 = vsel %vm407_vm0, %v404_v0, 0.0 }
  0x12   : > { %409 = vadd.xlane.f32.xlu0 %v408_v1 }
  0x9f   : > { %v410_v2 = vpop.xlane.xlu0 %409 }
  0xa0   : > { %v412_v3 = vmul.f32 0.03125, %v410_v2 }
  0xa2   : > { %v413_v4 = vsub.f32 %v404_v0, %v412_v3 }
  0xa4   : > { %v414_v5 = vmul.f32 %v413_v4, %v413_v4 }
  0xa6   : > { %v415_v6 = vsel %vm407_vm0, %v414_v5, 0.0 }
  0xa7   : > { %416 = vadd.xlane.f32.xlu0 %v415_v6 }
 0x134   : > { %v417_v12 = vpop.xlane.xlu0 %416 }
 0x135   : > { %v418_v13 = vmul.f32 0.03125, %v417_v12 }
 0x137   : > { %v419_v14 = vadd.f32 1e-06, %v418_v13 }
 0x139   : > { %866 = vrsqrt.f32 %v419_v14 }
 0x143   : > { %v867_v19 = vpop.eup %866 }
 0x144   : > { %v421_v21 = vmul.f32 %v867_v19, %v413_v4 }
 0x146   : > { %v428_v27 = vmul.f32 %v804_v20, %v421_v21 }
 0x148   : > { %v435_v28 = vadd.f32 %v805_v23, %v428_v27 }
 0x14a   : > { %v437_v34 = vrot.slane %v435_v28, 7  ;;  %v450_v37 = vmul.f32 %v448_v29, %v435_v28  ;;  %v467_v39 = vmul.f32 %v465_v32, %v435_v28  ;;  %v484_v48 = vmul.f32 %v482_v43, %v435_v28 }
 0x14c   : > { %v440_v35 = vsel %vm439_vm2, 0.0, %v437_v34 }
 0x14d   : > { %v458_v38 = vmul.f32 %v456_v31, %v440_v35  ;;  %v475_v40 = vmul.f32 %v473_v33, %v440_v35  ;;  %v492_v47 = vmul.f32 %v490_v36, %v440_v35 }
 0x14f   : > { %v459_v41 = vadd.f32 %v458_v38, %v450_v37  ;;  %v476_v42 = vadd.f32 %v475_v40, %v467_v39  ;;  %v493_v50 = vadd.f32 %v492_v47, %v484_v48 }
 0x151   : > { %v460_v45 = vpack.c.bf16 %v459_v41, %v459_v41  ;;  %v477_v46 = vpack.c.bf16 %v476_v42, %v476_v42  ;;  %v494_v51 = vpack.c.bf16 %v493_v50, %v493_v50 }
 0x153   : > { %831 = vmatmul.mubr.msk.bf16.vlgmr.msra.gmra.mrb[0].mxu0 %vm511_vm3, %v460_v45  ;;  %839 = vmatmul.mubr.msk.bf16.vlgmr.msra.gmra.mrb[0].mxu1 %vm511_vm3, %v477_v46 }
 0x154   : > { %843 = vmatpush3.bf16.msra.mxu0 %v864_v44  ;;  %846 = vmatprep.mubr.msk.bf16.mxu0 %vm877_vm1, %v876_v9 }
 0x155   : > { %844 = vmatprep.subr.bf16.mxu0 %v876_v9 }
 0x158   : > { %845 = vmatpush3.bf16.msra.mxu0 %v865_v49 }
 0x15b   : > { %847 = vmatmul.mubr.msk.bf16.vlgmr.msra.gmra.mrb[4].mxu0 %vm511_vm3, %v494_v51 }
 0x226   : > { %v549_v52 = vpop.f32.mrb[0].mxu0  ;;  %v611_v53 = vpop.f32.mrb[0].mxu1 }
 0x227   : > { %v555_v54 = vpack.c.bf16 %v549_v52, %v549_v52  ;;  %v617_v55 = vpack.c.bf16 %v611_v53, %v611_v53  ;;  %v832_v56 = vpop.f32.mrb[1].mxu0  ;;  %v840_v57 = vpop.f32.mrb[1].mxu1 }
 0x228   : > { %v552_v58 = vpop.f32.mrb[2].mxu0  ;;  %v614_v59 = vpop.f32.mrb[2].mxu1 }
 0x229   : > { %557 = vst.msk [vmem:[%s394_s12] sm:$0x3] %vm556_vm4, %v555_v54  ;;  %618 = vst.msk [vmem:[%s398_s15] sm:$0x3] %vm556_vm4, %v617_v55  ;;  %v833_v60 = vpop.f32.mrb[3].mxu0  ;;  %v841_v61 = vpop.f32.mrb[3].mxu1 }
 0x22e   : > { %v672_v62 = vpop.f32.mrb[4].mxu0 }
 0x22f   : > { %v678_v63 = vpack.c.bf16 %v672_v62, %v672_v62  ;;  %v848_v0 = vpop.f32.mrb[5].mxu0 }
 0x230   : > { %v675_v1 = vpop.f32.mrb[6].mxu0 }
 0x231   : > { %679 = vst.msk [vmem:[%s402_s19] sm:$0x3] %vm556_vm4, %v678_v63  ;;  %v849_v2 = vpop.f32.mrb[7].mxu0 }
 0x232 PF: > { %s22_s17 = sadd.s32 1, %s874_s17  }
 0x233   : > { %p19_p4 = scmp.ge.s32.totalorder %s22_s17, 4  }
 0x235   :  { %21 = sbr.rel (!%p19_p4) target bundleno = 1 (0x1), region = 110 }

// kernel: vision_rwkv_forward.13
= control target key start
LH: loop header
LB: loop body
LE: loop exit
PB: predicated region body
PF: predicated region fallthrough
CT: control target
= control target key end

     0   :  { %s1032_s21 = smov 0   ;;  %s1103_s0 = inlined_call_operand.vmem [shape: bf16[2,4,32], index: 0, kind: input, shape index: {}]   ;;  %s1104_s1 = inlined_call_operand.vmem [shape: bf16[2,4,32], index: 1, kind: input, shape index: {}]   ;;  %s1105_s2 = inlined_call_operand.vmem [shape: bf16[32,32], index: 2, kind: input, shape index: {}]   ;;  %s1106_s3 = inlined_call_operand.vmem [shape: f32[2,4,32], index: 3, kind: input, shape index: {}]   ;;  %s1107_s4 = inlined_call_operand.vmem [shape: f32[1,32], index: 4, kind: input, shape index: {}]   ;;  %s1108_s5 = inlined_call_operand.vmem [shape: f32[1,32], index: 5, kind: input, shape index: {}]   ;;  %s1109_s6 = inlined_call_operand.vmem [shape: f32[1,32], index: 6, kind: input, shape index: {}]   ;;  %s1110_s7 = inlined_call_operand.vmem [shape: f32[1,32], index: 7, kind: input, shape index: {}]   ;;  %s1111_s8 = inlined_call_operand.vmem [shape: bf16[32,64], index: 8, kind: input, shape index: {}]   ;;  %s1112_s9 = inlined_call_operand.vmem [shape: bf16[32,32], index: 9, kind: input, shape index: {}]   ;;  %s1113_s10 = inlined_call_operand.vmem [shape: f32[2,4,32], index: 10, kind: output, shape index: {0}]   ;;  %s1114_s11 = inlined_call_operand.vmem [shape: bf16[2,4,64], index: 11, kind: output, shape index: {1}]   ;;  %s1115_s12 = inlined_call_operand.vmem [shape: bf16[2,4,32], index: 12, kind: output, shape index: {2}]  }
   0x1 LB: > { %s877_s22 = sadd.s32 4294967295, %s963_s21   ;;  %p881_p0 = scmp.ge.s32.totalorder %s963_s21, 1  ;;  %s963_s21 = sphi %s1032_s21, %s23_s21  }
   0x2   : > { %p384_p1 = scmp.lt.s32.totalorder %s963_s21, 3 }
   0x4   : > { %p385_p2 = pnand %p881_p0, %p384_p1 }
   0x5   : > { %v945_v0 = vld [vmem:[%s1105_s2] sm:$0xff] (!%p385_p2)   ;;  %v965_v1 = vmov (!%p385_p2), 0.0   ;;  %v946_v2 = vld [vmem:[%s1105_s2 + $0x8] sm:$0xff] (!%p385_p2)   ;;  %vm966_vm0 = vmmov (!%p385_p2), 0   ;;  %p440_p3 = scmp.lt.s32.totalorder (!%p385_p2), %s877_s22, 1  ;;  %vm494_vm1 = vcmask (!%p385_p2), 261120   ;;  %v579_v32 = vlaneseq (!%p385_p2) }
   0x6   : > { %388 = sbr.rel (%p385_p2) target bundleno = 804 (0x324), region = 60  ;;  %911 = vmatprep.subr.bf16.mxu0 (!%p385_p2), %v965_v1  ;;  %919 = vmatprep.subr.bf16.mxu1 (!%p385_p2), %v965_v1  ;;  %vm539_vm2 = vcmask (!%p385_p2), 257024   ;;  %v947_v25 = vld [vmem:[%s1111_s8] sm:$0xff] (!%p385_p2)   ;;  %v949_v27 = vld [vmem:[%s1111_s8 + $0x8] sm:$0xff] (!%p385_p2)   ;;  %vm574_vm3 = vcmask (!%p385_p2), 1040384   ;;  %vm736_vm4 = vcmask (!%p385_p2), 254976  }
   0x7   : > { %912 = vmatpush3.bf16.msra.mxu0 (!%p385_p2), %v945_v0  ;;  %915 = vmatprep.mubr.msk.bf16.mxu0 (!%p385_p2), %vm966_vm0, %v965_v1  ;;  %v948_v26 = vld [vmem:[%s1112_s9] sm:$0xff] (!%p385_p2)   ;;  %v950_v28 = vld [vmem:[%s1112_s9 + $0x8] sm:$0xff] (!%p385_p2)   ;;  %v580_v33 = vshrl.u32 (!%p385_p2), %v579_v32, 7  ;;  %vm674_vm5 = vcmask (!%p385_p2), 517120  }
   0x8   : > { %913 = vmatprep.subr.bf16.mxu0 (!%p385_p2), %v965_v1  ;;  %923 = vmatprep.mubr.msk.bf16.mxu1 (!%p385_p2), %vm966_vm0, %v965_v1  ;;  %v576_v34 = vld [vmem:[%s1109_s6] sm:$0x1] (!%p385_p2) }
   0x9   : > { %920 = vmatpush3.bf16.msra.mxu1 (!%p385_p2), %v947_v25  ;;  %v577_v35 = vld [vmem:[%s1110_s7] sm:$0x1] (!%p385_p2)  ;;  %v581_v39 = vsub.s32 (!%p385_p2), 0, %v580_v33  ;;  %v585_v41 = vsub.f32 (!%p385_p2), 1.0, %v576_v34 }
   0xa   : > { %921 = vmatprep.subr.bf16.mxu1 (!%p385_p2), %v965_v1  ;;  %v892_v37 = vld [vmem:[%s1107_s4] ss:$0 sm:$0xff] (!%p385_p2)  ;;  %v602_v42 = vsub.f32 (!%p385_p2), 1.0, %v577_v35 }
   0xb   : > { %914 = vmatpush3.bf16.msra.mxu0 (!%p385_p2), %v946_v2  ;;  %v893_v40 = vld [vmem:[%s1108_s5] ss:$0 sm:$0xff] (!%p385_p2)  ;;  %v582_v45 = vrot.slane (!%p385_p2), %v576_v34, %v581_v39  ;;  %v590_v46 = vrot.slane (!%p385_p2), %v585_v41, %v581_v39  ;;  %v599_v48 = vrot.slane (!%p385_p2), %v577_v35, %v581_v39 }
   0xc   : > { %927 = vmatprep.subr.bf16.mxu0 (!%p385_p2), %v965_v1  ;;  %v607_v47 = vrot.slane (!%p385_p2), %v602_v42, %v581_v39 }
   0xd   : > { %s1117_s22 = smov (!%p440_p3, %s877_s22), 1  ;;  %922 = vmatpush3.bf16.msra.mxu1 %v949_v27 }
   0xe   : > { %s1048_s27 = sshll.u32 %s1117_s22, 1  ;;  %s884_s16 = sshll.u32 %s1117_s22, 2 }
   0xf   : > { %s443_s30 = scalar_lea.vmem %s1103_s0, %s1048_s27  ;;  %s447_s15 = scalar_lea.vmem %s1104_s1, %s1048_s27 }
  0x10   : > { %v465_v3 = vld [vmem:[%s443_s30] sm:$0x3]  ;;  %s451_s19 = scalar_lea.vmem %s1106_s3, %s884_s16  ;;  %s455_s24 = scalar_lea.vmem %s1113_s10, %s884_s16 }
  0x11   : > { %v466_v4 = vunpack.c.l.bf16 %v465_v3  ;;  %v473_v8 = vld [vmem:[%s447_s15] sm:$0x3]  ;;  %s463_s26 = scalar_lea.vmem %s1115_s12, %s1048_s27  ;;  %s459_s30 = scalar_lea.vmem %s1114_s11, %s1048_s27 }
  0x12   : > { %v474_v9 = vunpack.c.l.bf16 %v473_v8  ;;  %v477_v13 = vld [vmem:[%s451_s19] sm:$0xf] }
  0x13   : > { %v888_v5 = vmul.f32 -1.442695, %v466_v4 }
  0x15   : > { %951 = vpow2.f32 %v888_v5 }
  0x1f   : > { %v952_v6 = vpop.eup %951 }
  0x20   : > { %v470_v7 = vadd.f32 1.0, %v952_v6 }
  0x22   : > { %953 = vrcp.f32 %v470_v7 }
  0x2c   : > { %v954_v10 = vpop.eup %953 }
  0x2d   : > { %v475_v11 = vmul.f32 %v954_v10, %v474_v9 }
  0x2f   : > { %v476_v12 = vpack.c.bf16 %v475_v11, %v475_v11 }
  0x31   : > { %916 = vmatmul.mubr.msk.bf16.vlgmr.msra.gmra.mrb[0].mxu0 %vm494_vm1, %v476_v12 }
  0x32   : > { %931 = vmatprep.mubr.msk.bf16.mxu0 %vm966_vm0, %v965_v1  ;;  %928 = vmatpush3.bf16.msra.mxu0 %v948_v26 }
  0x33   : > { %929 = vmatprep.subr.bf16.mxu0 %v965_v1 }
  0x36   : > { %930 = vmatpush3.bf16.msra.mxu0 %v950_v28 }
 0x104   : > { %v532_v14 = vpop.f32.mrb[0].mxu0 }
 0x105   : > { %v538_v15 = vadd.f32 %v532_v14, %v477_v13  ;;  %v917_v16 = vpop.f32.mrb[1].mxu0 }
 0x106   : > { %v535_v17 = vpop.f32.mrb[2].mxu0 }
 0x107   : > { %v918_v18 = vpop.f32.mrb[3].mxu0  ;;  %v543_v19 = vsel %vm539_vm2, %v538_v15, 0.0  ;;  %540 = vst.msk [vmem:[%s455_s24] sm:$0xf] %vm539_vm2, %v538_v15 }
 0x108   : > { %544 = vadd.xlane.f32.xlu0 %v543_v19 }
 0x195   : > { %v545_v20 = vpop.xlane.xlu0 %544 }
 0x196   : > { %v547_v21 = vmul.f32 0.03125, %v545_v20 }
 0x198   : > { %v548_v22 = vsub.f32 %v538_v15, %v547_v21 }
 0x19a   : > { %v549_v23 = vmul.f32 %v548_v22, %v548_v22 }
 0x19c   : > { %v550_v24 = vsel %vm539_vm2, %v549_v23, 0.0 }
 0x19d   : > { %551 = vadd.xlane.f32.xlu0 %v550_v24 }
 0x22a   : > { %v552_v29 = vpop.xlane.xlu0 %551 }
 0x22b   : > { %v553_v30 = vmul.f32 0.03125, %v552_v29 }
 0x22d   : > { %v554_v31 = vadd.f32 1e-06, %v553_v30 }
 0x22f   : > { %955 = vrsqrt.f32 %v554_v31 }
 0x239   : > { %v956_v36 = vpop.eup %955 }
 0x23a   : > { %v556_v38 = vmul.f32 %v956_v36, %v548_v22 }
 0x23c   : > { %v563_v43 = vmul.f32 %v892_v37, %v556_v38 }
 0x23e   : > { %v570_v44 = vadd.f32 %v893_v40, %v563_v43 }
 0x240   : > { %v572_v49 = vrot.slane %v570_v44, 7  ;;  %v584_v51 = vmul.f32 %v582_v45, %v570_v44  ;;  %v601_v54 = vmul.f32 %v599_v48, %v570_v44 }
 0x242   : > { %v575_v50 = vsel %vm574_vm3, 0.0, %v572_v49 }
 0x243   : > { %v592_v52 = vmul.f32 %v590_v46, %v575_v50  ;;  %v609_v53 = vmul.f32 %v607_v47, %v575_v50 }
 0x245   : > { %v593_v55 = vadd.f32 %v592_v52, %v584_v51  ;;  %v610_v56 = vadd.f32 %v609_v53, %v601_v54 }
 0x247   : > { %v594_v57 = vpack.c.bf16 %v593_v55, %v593_v55  ;;  %v611_v58 = vpack.c.bf16 %v610_v56, %v610_v56 }
 0x249   : > { %924 = vmatmul.mubr.msk.bf16.vlgmr.msra.gmra.mrb[0].mxu1 %vm494_vm1, %v594_v57  ;;  %932 = vmatmul.mubr.msk.bf16.vlgmr.msra.gmra.mrb[4].mxu0 %vm494_vm1, %v611_v58 }
 0x31c   : > { %v665_v59 = vpop.f32.mrb[0].mxu1  ;;  %v729_v60 = vpop.f32.mrb[4].mxu0 }
 0x31d   : > { %v671_v61 = vmax.f32 %v665_v59, 0.0  ;;  %v735_v62 = vpack.c.bf16 %v729_v60, %v729_v60  ;;  %v925_v63 = vpop.f32.mrb[1].mxu1  ;;  %v933_v0 = vpop.f32.mrb[5].mxu0 }
 0x31e   : > { %v668_v1 = vpop.f32.mrb[2].mxu1  ;;  %v732_v2 = vpop.f32.mrb[6].mxu0 }
 0x31f   : > { %v672_v3 = vmul.f32 %v671_v61, %v671_v61  ;;  %737 = vst.msk [vmem:[%s463_s26] sm:$0x3] %vm736_vm4, %v735_v62  ;;  %v926_v4 = vpop.f32.mrb[3].mxu1  ;;  %v934_v5 = vpop.f32.mrb[7].mxu0 }
 0x321   : > { %v673_v6 = vpack.c.bf16 %v672_v3, %v672_v3 }
 0x323   : > { %675 = vst.msk [vmem:[%s459_s30] sm:$0x3] %vm674_vm5, %v673_v6 }
 0x324 PF: > { %s23_s21 = sadd.s32 1, %s963_s21  }
 0x325   : > { %p20_p4 = scmp.ge.s32.totalorder %s23_s21, 4  }
 0x327   :  { %22 = sbr.rel (!%p20_p4) target bundleno = 1 (0x1), region = 120 }

// kernel: vision_rwkv_forward.19
= control target key start
LH: loop header
LB: loop body
LE: loop exit
PB: predicated region body
PF: predicated region fallthrough
CT: control target
= control target key end

     0   :  { %vm18_vm0 = vcmask 261120   ;;  %s136_s0 = inlined_call_operand.vmem [shape: f32[8,32], index: 0, kind: input, shape index: {}]   ;;  %s137_s1 = inlined_call_operand.vmem [shape: f32[1,32], index: 1, kind: input, shape index: {}]   ;;  %s138_s2 = inlined_call_operand.vmem [shape: f32[1,32], index: 2, kind: input, shape index: {}]   ;;  %s139_s3 = inlined_call_operand.hbm [shape: f32[8,32], index: 3, kind: output, shape index: {}]  }
   0x1   :  { %v15_v0 = vld [vmem:[%s136_s0] sm:$0xff] }
   0x2   :  { %8 = vsyncpa [#allocation3], 0  ;;  %v19_v1 = vsel %vm18_vm0, %v15_v0, 0.0  ;;  %v62_v11 = vld [vmem:[%s137_s1] ss:$0 sm:$0xff]  ;;  %s91_s17 = smov [#allocation2]  }
   0x3   :  { %20 = vadd.xlane.f32.xlu0 %v19_v1  ;;  %v63_v13 = vld [vmem:[%s138_s2] ss:$0 sm:$0xff]  ;;  %s54_s18 = sshll.u32 %s91_s17, 4  ;;  %s55_s18 = int_to_ptr.vmem [resolvable:$true] %s54_s18 }
   0x4   :  { %s67_s19 = scalar_lea.vmem %s55_s18, 128  ;;  %p72_p1 = scmp.lt.s32.totalorder %s55_s18, %s55_s18 }
   0x5   :  { %p68_p0 = scmp.ne.s32.totalorder %s55_s18, %s67_s19  ;;  %p73_p2 = scmp.lt.s32.totalorder %s67_s19, %s67_s19 }
   0x7   :  { %p74_p3 = por %p73_p2, %p72_p1 }
   0x9   :  { %p75_p4 = pnand %p74_p3, %p68_p0 }
  0x90   :  { %v21_v2 = vpop.xlane.xlu0 %20 }
  0x91   :  { %v23_v3 = vmul.f32 0.03125, %v21_v2 }
  0x93   :  { %v24_v4 = vsub.f32 %v15_v0, %v23_v3 }
  0x95   :  { %v25_v5 = vmul.f32 %v24_v4, %v24_v4 }
  0x97   :  { %v26_v6 = vsel %vm18_vm0, %v25_v5, 0.0 }
  0x98   :  { %27 = vadd.xlane.f32.xlu0 %v26_v6 }
 0x125   :  { %v28_v7 = vpop.xlane.xlu0 %27 }
 0x126   :  { %v29_v8 = vmul.f32 0.03125, %v28_v7 }
 0x128   :  { %v30_v9 = vadd.f32 1e-06, %v29_v8 }
 0x12a   :  { %65 = vrsqrt.f32 %v30_v9 }
 0x134   :  { %v66_v10 = vpop.eup %65 }
 0x135   :  { %v32_v12 = vmul.f32 %v66_v10, %v24_v4 }
 0x137   :  { %v39_v14 = vmul.f32 %v62_v11, %v32_v12 }
 0x139   :  { %v46_v15 = vadd.f32 %v63_v13, %v39_v14 }
 0x13b   :  { %47 = vst.msk [vmem:[#allocation2] sm:$0xff] %vm18_vm0, %v46_v15 }
 0x13c   :  { %78 = shalt.err (!%p75_p4)
}
 0x13d   :  { %s79_s21 = scalar_lea.hbm %s139_s3, 128 }
 0x13e   :  { %p80_p5 = scmp.ne.s32.totalorder %s139_s3, %s79_s21  ;;  %p83_p6 = scmp.lt.u32.totalorder %s79_s21, %s139_s3 }
 0x140   :  { %p85_p7 = pnand %p83_p6, %p80_p5 }
 0x142   :  { %88 = shalt.err (!%p85_p7)
}
 0x143   :  { %57 = dma.vmem_to_hbm [thread:$0]  %s55_s18, 128, %s139_s3, [#allocation3]  }
 0x144   :  { %89 = dma.done.wait [#allocation3], 128  }
 0x145   :  { %90 = vsyncadd [#allocation3], 4294967168 }
 0x146   :  { %61 = vsyncpa [#allocation3], 1 }

// kernel: vision_rwkv_forward.14
= control target key start
LH: loop header
LB: loop body
LE: loop exit
PB: predicated region body
PF: predicated region fallthrough
CT: control target
= control target key end

     0   :  { %v400_v0 = vmov 0.0   ;;  %vm401_vm0 = vmmov 0   ;;  %vm69_vm1 = vcmask 523264   ;;  %vm126_vm2 = vcmask 261120   ;;  %s533_s1 = inlined_call_operand.vmem [shape: bf16[64,32], index: 1, kind: input, shape index: {}]   ;;  %s534_s0 = inlined_call_operand.vmem [shape: bf16[8,64], index: 0, kind: input, shape index: {}]   ;;  %s535_s2 = inlined_call_operand.vmem [shape: bf16[8,32], index: 2, kind: input, shape index: {}]   ;;  %s536_s3 = inlined_call_operand.vmem [shape: f32[8,32], index: 3, kind: input, shape index: {}]   ;;  %s537_s6 = inlined_call_operand.vmem [shape: bf16[32,64], index: 6, kind: input, shape index: {}]   ;;  %s538_s4 = inlined_call_operand.vmem [shape: f32[1,32], index: 4, kind: input, shape index: {}]   ;;  %s539_s5 = inlined_call_operand.vmem [shape: f32[1,32], index: 5, kind: input, shape index: {}]   ;;  %s540_s8 = inlined_call_operand.vmem [shape: bf16[64,32], index: 8, kind: input, shape index: {}]   ;;  %s541_s7 = inlined_call_operand.vmem [shape: f32[1,64], index: 7, kind: input, shape index: {}]   ;;  %s542_s9 = inlined_call_operand.vmem [shape: f32[1,32], index: 9, kind: input, shape index: {}]   ;;  %s543_s10 = inlined_call_operand.vmem [shape: f32[8,32], index: 10, kind: output, shape index: {}]  }
   0x1   :  { %348 = vmatprep.subr.bf16.mxu0 %v400_v0  ;;  %v382_v1 = vld [vmem:[%s533_s1] sm:$0xff]   ;;  %356 = vmatprep.mubr.msk.bf16.mxu0 %vm401_vm0, %v400_v0  ;;  %v383_v2 = vld [vmem:[%s533_s1 + $0x8] sm:$0xff]   ;;  %v384_v3 = vld [vmem:[%s533_s1 + $0x10] sm:$0xff]  }
   0x2   :  { %360 = vmatprep.subr.bf16.mxu1 %v400_v0  ;;  %364 = vmatprep.mubr.msk.bf16.mxu1 %vm401_vm0, %v400_v0  ;;  %v385_v4 = vld [vmem:[%s533_s1 + $0x18] sm:$0xff]   ;;  %v36_v5 = vld [vmem:[%s534_s0] sm:$0xf]  ;;  %v387_v26 = vld [vmem:[%s537_s6 + $0x8] sm:$0xff]  }
   0x3   :  { %349 = vmatpush3.bf16.msra.mxu0 %v382_v1  ;;  %v113_v6 = vld [vmem:[%s535_s2] sm:$0xf]  ;;  %v389_v38 = vld [vmem:[%s540_s8 + $0x8] sm:$0xff]   ;;  %v390_v39 = vld [vmem:[%s540_s8 + $0x10] sm:$0xff]  }
   0x4   :  { %350 = vmatprep.subr.bf16.mxu0 %v400_v0  ;;  %v114_v7 = vunpack.c.l.bf16 %v113_v6  ;;  %v121_v13 = vld [vmem:[%s536_s3] sm:$0xff]  ;;  %v391_v40 = vld [vmem:[%s540_s8 + $0x18] sm:$0xff]  }
   0x5   :  { %v386_v25 = vld [vmem:[%s537_s6] sm:$0xff]  }
   0x6   :  { %v322_v8 = vmul.f32 -1.442695, %v114_v7  ;;  %361 = vmatpush3.bf16.msra.mxu1 %v386_v25  ;;  %v323_v31 = vld [vmem:[%s538_s4] ss:$0 sm:$0xff] }
   0x7   :  { %351 = vmatpush3.bf16.msra.mxu0 %v383_v2  ;;  %362 = vmatprep.subr.bf16.mxu1 %v400_v0  ;;  %v324_v33 = vld [vmem:[%s539_s5] ss:$0 sm:$0xff] }
   0x8   :  { %352 = vmatprep.subr.bf16.mxu0 %v400_v0  ;;  %392 = vpow2.f32 %v322_v8  ;;  %v388_v37 = vld [vmem:[%s540_s8] sm:$0xff]  }
   0x9   :  { %v325_v41 = vld [vmem:[%s541_s7] ss:$0 sm:$0xff] }
   0xa   :  { %363 = vmatpush3.bf16.msra.mxu1 %v387_v26  ;;  %v334_v54 = vld [vmem:[%s542_s9] ss:$0 sm:$0xff] }
   0xb   :  { %353 = vmatpush3.bf16.msra.mxu0 %v384_v3  ;;  %368 = vmatprep.subr.bf16.mxu1 %v400_v0 }
   0xc   :  { %354 = vmatprep.subr.bf16.mxu0 %v400_v0 }
   0xf   :  { %355 = vmatpush3.bf16.msra.mxu0 %v385_v4 }
  0x12   :  { %357 = vmatmul.mubr.msk.bf16.vlgmr.msra.gmra.mrb[0].mxu0 %vm69_vm1, %v36_v5  ;;  %v393_v9 = vpop.eup %392 }
  0x13   :  { %v118_v10 = vadd.f32 1.0, %v393_v9 }
  0x15   :  { %394 = vrcp.f32 %v118_v10 }
  0x1f   :  { %v395_v11 = vpop.eup %394 }
  0xe5   :  { %v107_v12 = vpop.f32.mrb[0].mxu0 }
  0xe6   :  { %v122_v14 = vmul.f32 %v395_v11, %v107_v12  ;;  %v358_v15 = vpop.f32.mrb[1].mxu0 }
  0xe7   :  { %v110_v16 = vpop.f32.mrb[2].mxu0 }
  0xe8   :  { %v123_v17 = vadd.f32 %v122_v14, %v121_v13  ;;  %v359_v18 = vpop.f32.mrb[3].mxu0 }
  0xea   :  { %v127_v19 = vsel %vm126_vm2, %v123_v17, 0.0 }
  0xeb   :  { %128 = vadd.xlane.f32.xlu0 %v127_v19 }
 0x178   :  { %v129_v20 = vpop.xlane.xlu0 %128 }
 0x179   :  { %v131_v21 = vmul.f32 0.03125, %v129_v20 }
 0x17b   :  { %v132_v22 = vsub.f32 %v123_v17, %v131_v21 }
 0x17d   :  { %v133_v23 = vmul.f32 %v132_v22, %v132_v22 }
 0x17f   :  { %v134_v24 = vsel %vm126_vm2, %v133_v23, 0.0 }
 0x180   :  { %135 = vadd.xlane.f32.xlu0 %v134_v24 }
 0x20d   :  { %v136_v27 = vpop.xlane.xlu0 %135 }
 0x20e   :  { %v137_v28 = vmul.f32 0.03125, %v136_v27 }
 0x210   :  { %v138_v29 = vadd.f32 1e-06, %v137_v28 }
 0x212   :  { %396 = vrsqrt.f32 %v138_v29 }
 0x21c   :  { %v397_v30 = vpop.eup %396 }
 0x21d   :  { %v140_v32 = vmul.f32 %v397_v30, %v132_v22 }
 0x21f   :  { %v147_v34 = vmul.f32 %v323_v31, %v140_v32 }
 0x221   :  { %v154_v35 = vadd.f32 %v324_v33, %v147_v34 }
 0x223   :  { %v155_v36 = vpack.c.bf16 %v154_v35, %v154_v35 }
 0x225   :  { %365 = vmatmul.mubr.msk.bf16.vlgmr.msra.gmra.mrb[0].mxu1 %vm126_vm2, %v155_v36 }
 0x226   :  { %376 = vmatprep.mubr.msk.bf16.mxu1 %vm401_vm0, %v400_v0  ;;  %369 = vmatpush3.bf16.msra.mxu1 %v388_v37 }
 0x227   :  { %370 = vmatprep.subr.bf16.mxu1 %v400_v0 }
 0x22a   :  { %371 = vmatpush3.bf16.msra.mxu1 %v389_v38 }
 0x22b   :  { %372 = vmatprep.subr.bf16.mxu1 %v400_v0 }
 0x22e   :  { %373 = vmatpush3.bf16.msra.mxu1 %v390_v39 }
 0x22f   :  { %374 = vmatprep.subr.bf16.mxu1 %v400_v0 }
 0x232   :  { %375 = vmatpush3.bf16.msra.mxu1 %v391_v40 }
 0x2f8   :  { %v216_v42 = vpop.f32.mrb[0].mxu1 }
 0x2f9   :  { %v217_v43 = vadd.f32 %v325_v41, %v216_v42  ;;  %v366_v44 = vpop.f32.mrb[1].mxu1 }
 0x2fa   :  { %v219_v45 = vpop.f32.mrb[2].mxu1 }
 0x2fb   :  { %v223_v46 = vmul.f32 0.70710677, %v217_v43  ;;  %v367_v47 = vpop.f32.mrb[3].mxu1  ;;  %v222_v49 = vmul.f32 0.5, %v217_v43 }
 0x2fd   :  { %398 = verf.f32 %v223_v46 }
 0x307   :  { %v399_v48 = vpop.eup %398 }
 0x308   :  { %v225_v50 = vadd.f32 1.0, %v399_v48 }
 0x30a   :  { %v226_v51 = vmul.f32 %v225_v50, %v222_v49 }
 0x30c   :  { %v227_v52 = vpack.c.bf16 %v226_v51, %v226_v51 }
 0x30e   :  { %377 = vmatmul.mubr.msk.bf16.vlgmr.msra.gmra.mrb[4].mxu1 %vm69_vm1, %v227_v52 }
 0x3e1   :  { %v297_v53 = vpop.f32.mrb[4].mxu1 }
 0x3e2   :  { %v303_v55 = vadd.f32 %v297_v53, %v123_v17  ;;  %v378_v56 = vpop.f32.mrb[5].mxu1 }
 0x3e3   :  { %v300_v57 = vpop.f32.mrb[6].mxu1 }
 0x3e4   :  { %v311_v58 = vadd.f32 %v334_v54, %v303_v55  ;;  %v379_v59 = vpop.f32.mrb[7].mxu1 }
 0x3e6   :  { %312 = vst.msk [vmem:[%s543_s10] sm:$0xff] %vm126_vm2, %v311_v58 }

</bundles_post_ra>
